<compile_context>
chip_gen: v6e
topology: v6e:2x2x1
jax: 0.10.0
libtpu: 0.0.40
codegen_flags: <defaults>
</compile_context>

<pallas_src>
import math
import numpy as np
import jax
import jax.numpy as jnp
from jax.experimental import pallas as pl
from jax.experimental.pallas import tpu as pltpu


# ----------------------------- host-side helpers -----------------------------

def get_freq_indices_top16():
    all_top_indices_x = [0, 0, 6, 0, 0, 1, 1, 4, 5, 1, 3, 0, 0, 0, 3, 2]
    all_top_indices_y = [0, 1, 0, 5, 2, 0, 2, 0, 0, 6, 0, 4, 6, 3, 5, 2]
    return all_top_indices_x, all_top_indices_y


def build_filter(pos, freq, POS):
    result = math.cos(math.pi * freq * (pos + 0.5) / POS) / math.sqrt(POS)
    return result if freq == 0 else result * math.sqrt(2)


def make_dct_weights(dct_h, dct_w, num_freq=16):
    mx, my = get_freq_indices_top16()
    mx = [t * (dct_h // 7) for t in mx][:num_freq]
    my = [t * (dct_w // 7) for t in my][:num_freq]
    w = np.zeros((num_freq, dct_h, dct_w), np.float32)
    for f in range(num_freq):
        for tx in range(dct_h):
            for ty in range(dct_w):
                w[f, tx, ty] = build_filter(tx, mx[f], dct_h) * build_filter(ty, my[f], dct_w)
    return w  # (num_freq, 7, 7) -- channel-independent, as in the PyTorch module


def adaptive_pool_matrix(in_size, out_size):
    """P (out, in): adaptive_avg_pool1d as a matrix (PyTorch bin semantics)."""
    P = np.zeros((out_size, in_size), np.float32)
    for i in range(out_size):
        s = (i * in_size) // out_size
        e = -((-(i + 1) * in_size) // out_size)  # ceil
        P[i, s:e] = 1.0 / (e - s)
    return P


# ------------------------ kernel A: MFCA channel attention --------------------

def mfca_att_kernel(x_ref, p_ref, dcol_ref, davg_ref, wfc1_ref, wfc2_ref,
                    att_ref, pooled_acc, feats_ref):
    t = pl.program_id(1)

    @pl.when(t == 0)
    def _():
        pooled_acc[...] = jnp.zeros_like(pooled_acc)

    # Partial adaptive_avg_pool2d(x, (7,7)) for this HW tile:
    # (49, TILE) @ (TILE, C), accumulated over the (arbitrary) HW grid axis.
    # P already carries the 1/NF scaling (exact: NF is a power of two).
    pooled_acc[...] += jnp.dot(p_ref[...], x_ref[0].astype(jnp.float32),
                               preferred_element_type=jnp.float32)

    @pl.when(t == pl.num_programs(1) - 1)
    def _():
        pooled = pooled_acc[...]                               # (49, C), f32

        # avg branch collapsed into one MXU matmul (mean is linear).
        feat_avg = jnp.dot(davg_ref[...], pooled,
                           preferred_element_type=jnp.float32)  # (1, C)

        NF = dcol_ref.shape[0]
        C = pooled.shape[1]
        feat_max = jnp.zeros((1, C), jnp.float32)
        feat_min = jnp.zeros((1, C), jnp.float32)
        for f in range(NF):        # static unroll; max/min cannot be collapsed
            s = pooled * dcol_ref[f]                           # (49,1) lane-broadcast
            feat_max = feat_max + jnp.max(s, axis=0, keepdims=True)
            feat_min = feat_min + jnp.min(s, axis=0, keepdims=True)

        # Batch the three fc() calls into one (3, C) matmul pair.
        feats_ref[0:1, :] = feat_avg
        feats_ref[1:2, :] = feat_max
        feats_ref[2:3, :] = feat_min
        h = jnp.maximum(jnp.dot(feats_ref[...], wfc1_ref[...],
                                preferred_element_type=jnp.float32), 0.0)
        z = jnp.dot(h, wfc2_ref[...], preferred_element_type=jnp.float32)  # (3, C)
        att_ref[0] = jax.nn.sigmoid(jnp.sum(z, axis=0, keepdims=True))     # (1, C)


# --------------------- kernel B: shortcut + attention + FFN -------------------

def psa_ffn_kernel(x_ref, att_ref, w1_ref, b1_ref, w2_ref, b2_ref, o_ref):
    x = x_ref[0].astype(jnp.float32)                           # (TILE, C)
    att = att_ref[0]                                           # (1, C) f32

    # x = x + attn(x)  (attn(x) = x * att)
    x1 = x * (1.0 + att)

    # FFN: Conv(c, 2c, 1) [conv+BN folded, SiLU] -> Conv(2c, c, 1) [no act]
    # bf16 MXU matmuls with f32 accumulation; elementwise math stays f32.
    h = jnp.dot(x1.astype(jnp.bfloat16), w1_ref[...],
                preferred_element_type=jnp.float32) + b1_ref[...]
    h = h * jax.nn.sigmoid(h)                                  # SiLU
    y = jnp.dot(h.astype(jnp.bfloat16), w2_ref[...],
                preferred_element_type=jnp.float32) + b2_ref[...]

    # x = x + ffn(x)
    o_ref[0] = x1 + y


# -------------------------------- wrapper -------------------------------------

def psa_mfca_forward(x_nchw, params, hw_tile=None):
    B, C, H, W = x_nchw.shape
    HW = H * W
    NF = params["dct"].shape[0]
    CR = params["wfc1"].shape[1]
    C2 = params["w1"].shape[1]

    if hw_tile is None:
        for cand in (1024, 512, 256, 128):
            if HW % cand == 0:
                hw_tile = cand
                break
        else:
            hw_tile = HW
    assert HW % hw_tile == 0
    nt = HW // hw_tile

    # x stored as bf16 (halves HBM traffic of the big tensor); channels on lanes.
    x = jnp.transpose(x_nchw, (0, 2, 3, 1)).reshape(B, HW, C).astype(jnp.bfloat16)

    # Combined adaptive-pool matrix (49, HW), with the 1/NF scaling folded in.
    Ph = adaptive_pool_matrix(H, 7)
    Pw = adaptive_pool_matrix(W, 7)
    P_np = np.einsum("ih,jw->ijhw", Ph, Pw).reshape(49, HW) / float(NF)
    P = jnp.asarray(P_np, jnp.float32)

    # DCT tables: per-frequency (49,1) columns (no broadcast along C) and the
    # collapsed avg row (1/49)*sum_f dct_f used by the single avg matmul.
    dct_flat = params["dct"].reshape(NF, 49).astype(np.float32)
    dcol = jnp.asarray(dct_flat[:, :, None], jnp.float32)             # (NF, 49, 1)
    davg = jnp.asarray((dct_flat.sum(axis=0) / 49.0)[None, :], jnp.float32)  # (1, 49)

    # fc weights are tiny -> keep f32 (accumulation / attention fidelity).
    wfc1 = params["wfc1"].astype(jnp.float32)
    wfc2 = params["wfc2"].astype(jnp.float32)
    # FFN weights in bf16 (dominant FLOPs/bytes), biases stay f32.
    w1b = params["w1"].astype(jnp.bfloat16)
    w2b = params["w2"].astype(jnp.bfloat16)
    b1 = params["b1"].astype(jnp.float32)
    b2 = params["b2"].astype(jnp.float32)

    # ---- pass A: channel attention vector (B, 1, C) ----
    att = pl.pallas_call(
        mfca_att_kernel,
        out_shape=jax.ShapeDtypeStruct((B, 1, C), jnp.float32),
        grid_spec=pltpu.PrefetchScalarGridSpec(
            num_scalar_prefetch=0,
            grid=(B, nt),
            in_specs=[
                pl.BlockSpec((1, hw_tile, C), lambda b, t: (b, t, 0)),  # x (bf16)
                pl.BlockSpec((49, hw_tile), lambda b, t: (0, t)),       # pool matrix /NF
                pl.BlockSpec((NF, 49, 1), lambda b, t: (0, 0, 0)),      # per-freq DCT cols
                pl.BlockSpec((1, 49), lambda b, t: (0, 0)),             # collapsed avg row
                pl.BlockSpec((C, CR), lambda b, t: (0, 0)),             # fc1
                pl.BlockSpec((CR, C), lambda b, t: (0, 0)),             # fc2
            ],
            out_specs=pl.BlockSpec((1, 1, C), lambda b, t: (b, 0, 0)),
            scratch_shapes=[pltpu.VMEM((49, C), jnp.float32),           # pooled accum
                            pltpu.VMEM((3, C), jnp.float32)],           # stacked feats
        ),
        compiler_params=pltpu.CompilerParams(
            dimension_semantics=("parallel", "arbitrary")),
    )(x, P, dcol, davg, wfc1, wfc2)

    # ---- pass B: x*(1+att) + FFN, tiled over (B, HW) ----
    out = pl.pallas_call(
        psa_ffn_kernel,
        out_shape=jax.ShapeDtypeStruct((B, HW, C), jnp.float32),
        grid_spec=pltpu.PrefetchScalarGridSpec(
            num_scalar_prefetch=0,
            grid=(B, nt),
            in_specs=[
                pl.BlockSpec((1, hw_tile, C), lambda b, t: (b, t, 0)),  # x (bf16)
                pl.BlockSpec((1, 1, C), lambda b, t: (b, 0, 0)),        # att (f32)
                pl.BlockSpec((C, C2), lambda b, t: (0, 0)),             # ffn conv1 (bf16, BN folded)
                pl.BlockSpec((1, C2), lambda b, t: (0, 0)),             # ffn bias1
                pl.BlockSpec((C2, C), lambda b, t: (0, 0)),             # ffn conv2 (bf16, BN folded)
                pl.BlockSpec((1, C), lambda b, t: (0, 0)),              # ffn bias2
            ],
            out_specs=pl.BlockSpec((1, hw_tile, C), lambda b, t: (b, t, 0)),
        ),
        compiler_params=pltpu.CompilerParams(
            dimension_semantics=("parallel", "parallel")),
    )(x, att, w1b, b1, w2b, b2)

    return jnp.transpose(out.reshape(B, H, W, C), (0, 3, 1, 2))


# ----------------------------- parameter setup --------------------------------

def make_params(C, key):
    """Deterministic synthetic weights; BN folded in inference mode."""
    CR = C // 16
    C2 = 2 * C
    ks = jax.random.split(key, 12)
    eps = 1e-5

    # MFCA fc: Conv2d(C, C/r, 1, bias=False) -> ReLU -> Conv2d(C/r, C, 1, bias=False)
    wfc1_t = jax.random.normal(ks[0], (CR, C), jnp.float32) * 0.2   # (out, in)
    wfc2_t = jax.random.normal(ks[1], (C, CR), jnp.float32) * 0.2

    # FFN Conv(c, 2c, 1): conv weight + BN (gamma, beta, mean, var)
    conv1_w = jax.random.normal(ks[2], (C2, C), jnp.float32) * 0.1
    g1 = jax.random.uniform(ks[3], (C2,), jnp.float32, 0.5, 1.5)
    be1 = jax.random.normal(ks[4], (C2,), jnp.float32) * 0.1
    mu1 = jax.random.normal(ks[5], (C2,), jnp.float32) * 0.1
    var1 = jax.random.uniform(ks[6], (C2,), jnp.float32, 0.5, 1.5)

    # FFN Conv(2c, c, 1, act=False)
    conv2_w = jax.random.normal(ks[7], (C, C2), jnp.float32) * 0.1
    g2 = jax.random.uniform(ks[8], (C,), jnp.float32, 0.5, 1.5)
    be2 = jax.random.normal(ks[9], (C,), jnp.float32) * 0.1
    mu2 = jax.random.normal(ks[10], (C,), jnp.float32) * 0.1
    var2 = jax.random.uniform(ks[11], (C,), jnp.float32, 0.5, 1.5)

    # TODO(synk): BatchNorm is folded using fixed "running" stats (inference mode);
    # training-mode batch statistics are not reproduced.
    s1 = g1 / jnp.sqrt(var1 + eps)
    w1 = (conv1_w * s1[:, None]).T                 # (C, 2C)  for x @ W
    b1 = (be1 - mu1 * s1)[None, :]                 # (1, 2C)
    s2 = g2 / jnp.sqrt(var2 + eps)
    w2 = (conv2_w * s2[:, None]).T                 # (2C, C)
    b2 = (be2 - mu2 * s2)[None, :]                 # (1, C)

    return {
        "dct": make_dct_weights(7, 7, 16),         # (16, 7, 7) numpy
        "wfc1": wfc1_t.T,                          # (C, CR)
        "wfc2": wfc2_t.T,                          # (CR, C)
        "w1": w1, "b1": b1, "w2": w2, "b2": b2,
    }


# ------------------------------ pure-JAX reference ----------------------------

def reference_forward(x_nchw, params):
    """Module semantics; mirrors the kernel's bf16 storage precision for x and
    the FFN matmul operands (f32 accumulation), so tolerances stay tight."""
    B, C, H, W = x_nchw.shape
    NF = params["dct"].shape[0]
    xb = x_nchw.astype(jnp.bfloat16).astype(jnp.float32)

    dct = jnp.asarray(params["dct"])               # (16, 7, 7)
    Ph = jnp.asarray(adaptive_pool_matrix(H, 7))
    Pw = jnp.asarray(adaptive_pool_matrix(W, 7))
    pooled = jnp.einsum("ih,bchw,jw->bcij", Ph, xb, Pw)   # (B, C, 7, 7)

    avg = mx = mn = 0.0
    for f in range(NF):
        s = pooled * dct[f][None, None]
        avg = avg + s.mean(axis=(2, 3))
        mx = mx + s.max(axis=(2, 3))
        mn = mn + s.min(axis=(2, 3))
    avg, mx, mn = avg / NF, mx / NF, mn / NF

    def fc(v):  # (B, C)
        h = jnp.maximum(v @ params["wfc1"], 0.0)
        return h @ params["wfc2"]

    att = jax.nn.sigmoid(fc(avg) + fc(mx) + fc(mn))[:, :, None, None]
    x1 = xb + xb * att

    xf = jnp.transpose(x1, (0, 2, 3, 1)).reshape(B * H * W, C)
    w1b = params["w1"].astype(jnp.bfloat16)
    w2b = params["w2"].astype(jnp.bfloat16)
    h = jnp.dot(xf.astype(jnp.bfloat16), w1b,
                preferred_element_type=jnp.float32) + params["b1"]
    h = h * jax.nn.sigmoid(h)
    y = jnp.dot(h.astype(jnp.bfloat16), w2b,
                preferred_element_type=jnp.float32) + params["b2"]
    y = jnp.transpose(y.reshape(B, H, W, C), (0, 3, 1, 2))
    return x1 + y


# ----------------------------------- main -------------------------------------

if __name__ == "__main__":
    # C multiple of 128 keeps every lane dimension dense (reduction=16 -> CR=8).
    B, C, H, W = 2, 128, 16, 16
    key = jax.random.PRNGKey(0)
    kx, kp = jax.random.split(key)
    x = jax.random.normal(kx, (B, C, H, W), jnp.float32)
    params = make_params(C, kp)

    # hw_tile=128 -> 2 HW tiles per batch: exercises the pooled-accumulator pass
    # and the parallel (B, HW-tile) FFN grid.
    out = jax.block_until_ready(psa_mfca_forward(x, params, hw_tile=128))
    ref = jax.block_until_ready(reference_forward(x, params))

    assert out.shape == (B, C, H, W)
    err = float(np.max(np.abs(np.asarray(out) - np.asarray(ref))))
    assert np.allclose(np.asarray(out), np.asarray(ref), rtol=2e-3, atol=2e-3), err

    print("KERNEL_OK")
</pallas_src>

<mosaic_0001>
module attributes {stable_mosaic.version = 11 : i64} {
  func.func @mfca_att_kernel(%arg0: i32, %arg1: i32, %arg2: memref<1x128x128xbf16, #tpu.memory_space<vmem>>, %arg3: memref<49x128xf32, #tpu.memory_space<vmem>>, %arg4: memref<16x49x1xf32, #tpu.memory_space<vmem>>, %arg5: memref<1x49xf32, #tpu.memory_space<vmem>>, %arg6: memref<128x8xf32, #tpu.memory_space<vmem>>, %arg7: memref<8x128xf32, #tpu.memory_space<vmem>>, %arg8: memref<1x1x128xf32, #tpu.memory_space<vmem>>, %arg9: memref<49x128xf32, #tpu.memory_space<vmem>>, %arg10: memref<3x128xf32, #tpu.memory_space<vmem>>) attributes {dimension_semantics = [#tpu.dimension_semantics<parallel>, #tpu.dimension_semantics<arbitrary>], iteration_bounds = array<i64: 2, 2>, scalar_prefetch = 0 : i64, scratch_operands = 2 : i64, tpu.core_type = #tpu.core_type<tc>, window_params = [{transform_indices = @transform_0, window_bounds = array<i64: 1, 128, 128>}, {transform_indices = @transform_1, window_bounds = array<i64: 49, 128>}, {pipeline_mode = #tpu.pipeline_mode<synchronous>, transform_indices = @transform_2, window_bounds = array<i64: 16, 49, 1>}, {pipeline_mode = #tpu.pipeline_mode<synchronous>, transform_indices = @transform_3, window_bounds = array<i64: 1, 49>}, {pipeline_mode = #tpu.pipeline_mode<synchronous>, transform_indices = @transform_4, window_bounds = array<i64: 128, 8>}, {pipeline_mode = #tpu.pipeline_mode<synchronous>, transform_indices = @transform_5, window_bounds = array<i64: 8, 128>}, {transform_indices = @transform_6, window_bounds = array<i64: 1, 1, 128>}]} {
    %c0_i32 = arith.constant 0 : i32
    %0 = arith.cmpi eq, %arg1, %c0_i32 : i32
    %1 = arith.extui %0 : i1 to i32
    %c0_i32_0 = arith.constant 0 : i32
    %2 = arith.cmpi ne, %1, %c0_i32_0 : i32
    scf.if %2 {
      %cst_10 = arith.constant 0.000000e+00 : f32
      %14 = vector.broadcast %cst_10 : f32 to vector<49x128xf32>
      %c0_11 = arith.constant 0 : index
      %c0_12 = arith.constant 0 : index
      %15 = vector.load %arg9[%c0_11, %c0_12] : memref<49x128xf32, #tpu.memory_space<vmem>>, vector<49x128xf32>
      tpu.vector_store %arg9[%c0_11, %c0_12], %14 {strides = array<i32>} : memref<49x128xf32, #tpu.memory_space<vmem>>, vector<49x128xf32>,
    } else {
    }
    %c0 = arith.constant 0 : index
    %c0_1 = arith.constant 0 : index
    %3 = vector.load %arg9[%c0, %c0_1] : memref<49x128xf32, #tpu.memory_space<vmem>>, vector<49x128xf32>
    %c0_2 = arith.constant 0 : index
    %c0_3 = arith.constant 0 : index
    %4 = vector.load %arg3[%c0_2, %c0_3] : memref<49x128xf32, #tpu.memory_space<vmem>>, vector<49x128xf32>
    %c0_4 = arith.constant 0 : index
    %c0_5 = arith.constant 0 : index
    %c0_6 = arith.constant 0 : index
    %5 = vector.load %arg2[%c0_4, %c0_5, %c0_6] : memref<1x128x128xbf16, #tpu.memory_space<vmem>>, vector<1x128x128xbf16>
    %6 = vector.shape_cast %5 : vector<1x128x128xbf16> to vector<128x128xbf16>
    %7 = arith.extf %6 : vector<128x128xbf16> to vector<128x128xf32>
    %cst = arith.constant dense<0.000000e+00> : vector<49x128xf32>
    %8 = tpu.matmul %4, %7, %cst {dimension_numbers = #tpu.dot_dimension_numbers<[1], [0], [0], [1], [0, 0, 1, 1], [], []>} : vector<49x128xf32>, vector<128x128xf32>, vector<49x128xf32> -> vector<49x128xf32>
    %9 = arith.addf %3, %8 : vector<49x128xf32>
    %c0_7 = arith.constant 0 : index
    %c0_8 = arith.constant 0 : index
    %10 = vector.load %arg9[%c0_7, %c0_8] : memref<49x128xf32, #tpu.memory_space<vmem>>, vector<49x128xf32>
    tpu.vector_store %arg9[%c0_7, %c0_8], %9 {strides = array<i32>} : memref<49x128xf32, #tpu.memory_space<vmem>>, vector<49x128xf32>,
    %c1_i32 = arith.constant 1 : i32
    %11 = arith.cmpi eq, %arg1, %c1_i32 : i32
    %12 = arith.extui %11 : i1 to i32
    %c0_i32_9 = arith.constant 0 : i32
    %13 = arith.cmpi ne, %12, %c0_i32_9 : i32
    scf.if %13 {
      %c0_10 = arith.constant 0 : index
      %c0_11 = arith.constant 0 : index
      %14 = vector.load %arg9[%c0_10, %c0_11] : memref<49x128xf32, #tpu.memory_space<vmem>>, vector<49x128xf32>
      %c0_12 = arith.constant 0 : index
      %c0_13 = arith.constant 0 : index
      %15 = vector.load %arg5[%c0_12, %c0_13] : memref<1x49xf32, #tpu.memory_space<vmem>>, vector<1x49xf32>
      %cst_14 = arith.constant dense<0.000000e+00> : vector<1x128xf32>
      %16 = tpu.matmul %15, %14, %cst_14 {dimension_numbers = #tpu.dot_dimension_numbers<[1], [0], [0], [1], [0, 0, 1, 1], [], []>} : vector<1x49xf32>, vector<49x128xf32>, vector<1x128xf32> -> vector<1x128xf32>
      %cst_15 = arith.constant 0.000000e+00 : f32
      %17 = vector.broadcast %cst_15 : f32 to vector<1x128xf32>
      %cst_16 = arith.constant 0.000000e+00 : f32
      %18 = vector.broadcast %cst_16 : f32 to vector<1x128xf32>
      %c0_17 = arith.constant 0 : index
      %c0_18 = arith.constant 0 : index
      %c0_19 = arith.constant 0 : index
      %19 = vector.load %arg4[%c0_17, %c0_18, %c0_19] : memref<16x49x1xf32, #tpu.memory_space<vmem>>, vector<1x49x1xf32>
      %20 = vector.shape_cast %19 : vector<1x49x1xf32> to vector<49x1xf32>
      %21 = vector.broadcast %20 : vector<49x1xf32> to vector<49x128xf32>
      %22 = arith.mulf %14, %21 : vector<49x128xf32>
      %cst_20 = arith.constant dense<0xFF800000> : vector<128xf32>
      %23 = vector.multi_reduction <maximumf>, %22, %cst_20 [0] : vector<49x128xf32> to vector<128xf32>
      %24 = vector.shape_cast %23 : vector<128xf32> to vector<1x128xf32>
      %25 = arith.addf %17, %24 : vector<1x128xf32>
      %cst_21 = arith.constant dense<0x7F800000> : vector<128xf32>
      %26 = vector.multi_reduction <minimumf>, %22, %cst_21 [0] : vector<49x128xf32> to vector<128xf32>
      %27 = vector.shape_cast %26 : vector<128xf32> to vector<1x128xf32>
      %28 = arith.addf %18, %27 : vector<1x128xf32>
      %c1 = arith.constant 1 : index
      %c0_22 = arith.constant 0 : index
      %c0_23 = arith.constant 0 : index
      %29 = vector.load %arg4[%c1, %c0_22, %c0_23] : memref<16x49x1xf32, #tpu.memory_space<vmem>>, vector<1x49x1xf32>
      %30 = vector.shape_cast %29 : vector<1x49x1xf32> to vector<49x1xf32>
      %31 = vector.broadcast %30 : vector<49x1xf32> to vector<49x128xf32>
      %32 = arith.mulf %14, %31 : vector<49x128xf32>
      %cst_24 = arith.constant dense<0xFF800000> : vector<128xf32>
      %33 = vector.multi_reduction <maximumf>, %32, %cst_24 [0] : vector<49x128xf32> to vector<128xf32>
      %34 = vector.shape_cast %33 : vector<128xf32> to vector<1x128xf32>
      %35 = arith.addf %25, %34 : vector<1x128xf32>
      %cst_25 = arith.constant dense<0x7F800000> : vector<128xf32>
      %36 = vector.multi_reduction <minimumf>, %32, %cst_25 [0] : vector<49x128xf32> to vector<128xf32>
      %37 = vector.shape_cast %36 : vector<128xf32> to vector<1x128xf32>
      %38 = arith.addf %28, %37 : vector<1x128xf32>
      %c2 = arith.constant 2 : index
      %c0_26 = arith.constant 0 : index
      %c0_27 = arith.constant 0 : index
      %39 = vector.load %arg4[%c2, %c0_26, %c0_27] : memref<16x49x1xf32, #tpu.memory_space<vmem>>, vector<1x49x1xf32>
      %40 = vector.shape_cast %39 : vector<1x49x1xf32> to vector<49x1xf32>
      %41 = vector.broadcast %40 : vector<49x1xf32> to vector<49x128xf32>
      %42 = arith.mulf %14, %41 : vector<49x128xf32>
      %cst_28 = arith.constant dense<0xFF800000> : vector<128xf32>
      %43 = vector.multi_reduction <maximumf>, %42, %cst_28 [0] : vector<49x128xf32> to vector<128xf32>
      %44 = vector.shape_cast %43 : vector<128xf32> to vector<1x128xf32>
      %45 = arith.addf %35, %44 : vector<1x128xf32>
      %cst_29 = arith.constant dense<0x7F800000> : vector<128xf32>
      %46 = vector.multi_reduction <minimumf>, %42, %cst_29 [0] : vector<49x128xf32> to vector<128xf32>
      %47 = vector.shape_cast %46 : vector<128xf32> to vector<1x128xf32>
      %48 = arith.addf %38, %47 : vector<1x128xf32>
      %c3 = arith.constant 3 : index
      %c0_30 = arith.constant 0 : index
      %c0_31 = arith.constant 0 : index
      %49 = vector.load %arg4[%c3, %c0_30, %c0_31] : memref<16x49x1xf32, #tpu.memory_space<vmem>>, vector<1x49x1xf32>
      %50 = vector.shape_cast %49 : vector<1x49x1xf32> to vector<49x1xf32>
      %51 = vector.broadcast %50 : vector<49x1xf32> to vector<49x128xf32>
      %52 = arith.mulf %14, %51 : vector<49x128xf32>
      %cst_32 = arith.constant dense<0xFF800000> : vector<128xf32>
      %53 = vector.multi_reduction <maximumf>, %52, %cst_32 [0] : vector<49x128xf32> to vector<128xf32>
      %54 = vector.shape_cast %53 : vector<128xf32> to vector<1x128xf32>
      %55 = arith.addf %45, %54 : vector<1x128xf32>
      %cst_33 = arith.constant dense<0x7F800000> : vector<128xf32>
      %56 = vector.multi_reduction <minimumf>, %52, %cst_33 [0] : vector<49x128xf32> to vector<128xf32>
      %57 = vector.shape_cast %56 : vector<128xf32> to vector<1x128xf32>
      %58 = arith.addf %48, %57 : vector<1x128xf32>
      %c4 = arith.constant 4 : index
      %c0_34 = arith.constant 0 : index
      %c0_35 = arith.constant 0 : index
      %59 = vector.load %arg4[%c4, %c0_34, %c0_35] : memref<16x49x1xf32, #tpu.memory_space<vmem>>, vector<1x49x1xf32>
      %60 = vector.shape_cast %59 : vector<1x49x1xf32> to vector<49x1xf32>
      %61 = vector.broadcast %60 : vector<49x1xf32> to vector<49x128xf32>
      %62 = arith.mulf %14, %61 : vector<49x128xf32>
      %cst_36 = arith.constant dense<0xFF800000> : vector<128xf32>
      %63 = vector.multi_reduction <maximumf>, %62, %cst_36 [0] : vector<49x128xf32> to vector<128xf32>
      %64 = vector.shape_cast %63 : vector<128xf32> to vector<1x128xf32>
      %65 = arith.addf %55, %64 : vector<1x128xf32>
      %cst_37 = arith.constant dense<0x7F800000> : vector<128xf32>
      %66 = vector.multi_reduction <minimumf>, %62, %cst_37 [0] : vector<49x128xf32> to vector<128xf32>
      %67 = vector.shape_cast %66 : vector<128xf32> to vector<1x128xf32>
      %68 = arith.addf %58, %67 : vector<1x128xf32>
      %c5 = arith.constant 5 : index
      %c0_38 = arith.constant 0 : index
      %c0_39 = arith.constant 0 : index
      %69 = vector.load %arg4[%c5, %c0_38, %c0_39] : memref<16x49x1xf32, #tpu.memory_space<vmem>>, vector<1x49x1xf32>
      %70 = vector.shape_cast %69 : vector<1x49x1xf32> to vector<49x1xf32>
      %71 = vector.broadcast %70 : vector<49x1xf32> to vector<49x128xf32>
      %72 = arith.mulf %14, %71 : vector<49x128xf32>
      %cst_40 = arith.constant dense<0xFF800000> : vector<128xf32>
      %73 = vector.multi_reduction <maximumf>, %72, %cst_40 [0] : vector<49x128xf32> to vector<128xf32>
      %74 = vector.shape_cast %73 : vector<128xf32> to vector<1x128xf32>
      %75 = arith.addf %65, %74 : vector<1x128xf32>
      %cst_41 = arith.constant dense<0x7F800000> : vector<128xf32>
      %76 = vector.multi_reduction <minimumf>, %72, %cst_41 [0] : vector<49x128xf32> to vector<128xf32>
      %77 = vector.shape_cast %76 : vector<128xf32> to vector<1x128xf32>
      %78 = arith.addf %68, %77 : vector<1x128xf32>
      %c6 = arith.constant 6 : index
      %c0_42 = arith.constant 0 : index
      %c0_43 = arith.constant 0 : index
      %79 = vector.load %arg4[%c6, %c0_42, %c0_43] : memref<16x49x1xf32, #tpu.memory_space<vmem>>, vector<1x49x1xf32>
      %80 = vector.shape_cast %79 : vector<1x49x1xf32> to vector<49x1xf32>
      %81 = vector.broadcast %80 : vector<49x1xf32> to vector<49x128xf32>
      %82 = arith.mulf %14, %81 : vector<49x128xf32>
      %cst_44 = arith.constant dense<0xFF800000> : vector<128xf32>
      %83 = vector.multi_reduction <maximumf>, %82, %cst_44 [0] : vector<49x128xf32> to vector<128xf32>
      %84 = vector.shape_cast %83 : vector<128xf32> to vector<1x128xf32>
      %85 = arith.addf %75, %84 : vector<1x128xf32>
      %cst_45 = arith.constant dense<0x7F800000> : vector<128xf32>
      %86 = vector.multi_reduction <minimumf>, %82, %cst_45 [0] : vector<49x128xf32> to vector<128xf32>
      %87 = vector.shape_cast %86 : vector<128xf32> to vector<1x128xf32>
      %88 = arith.addf %78, %87 : vector<1x128xf32>
      %c7 = arith.constant 7 : index
      %c0_46 = arith.constant 0 : index
      %c0_47 = arith.constant 0 : index
      %89 = vector.load %arg4[%c7, %c0_46, %c0_47] : memref<16x49x1xf32, #tpu.memory_space<vmem>>, vector<1x49x1xf32>
      %90 = vector.shape_cast %89 : vector<1x49x1xf32> to vector<49x1xf32>
      %91 = vector.broadcast %90 : vector<49x1xf32> to vector<49x128xf32>
      %92 = arith.mulf %14, %91 : vector<49x128xf32>
      %cst_48 = arith.constant dense<0xFF800000> : vector<128xf32>
      %93 = vector.multi_reduction <maximumf>, %92, %cst_48 [0] : vector<49x128xf32> to vector<128xf32>
      %94 = vector.shape_cast %93 : vector<128xf32> to vector<1x128xf32>
      %95 = arith.addf %85, %94 : vector<1x128xf32>
      %cst_49 = arith.constant dense<0x7F800000> : vector<128xf32>
      %96 = vector.multi_reduction <minimumf>, %92, %cst_49 [0] : vector<49x128xf32> to vector<128xf32>
      %97 = vector.shape_cast %96 : vector<128xf32> to vector<1x128xf32>
      %98 = arith.addf %88, %97 : vector<1x128xf32>
      %c8 = arith.constant 8 : index
      %c0_50 = arith.constant 0 : index
      %c0_51 = arith.constant 0 : index
      %99 = vector.load %arg4[%c8, %c0_50, %c0_51] : memref<16x49x1xf32, #tpu.memory_space<vmem>>, vector<1x49x1xf32>
      %100 = vector.shape_cast %99 : vector<1x49x1xf32> to vector<49x1xf32>
      %101 = vector.broadcast %100 : vector<49x1xf32> to vector<49x128xf32>
      %102 = arith.mulf %14, %101 : vector<49x128xf32>
      %cst_52 = arith.constant dense<0xFF800000> : vector<128xf32>
      %103 = vector.multi_reduction <maximumf>, %102, %cst_52 [0] : vector<49x128xf32> to vector<128xf32>
      %104 = vector.shape_cast %103 : vector<128xf32> to vector<1x128xf32>
      %105 = arith.addf %95, %104 : vector<1x128xf32>
      %cst_53 = arith.constant dense<0x7F800000> : vector<128xf32>
      %106 = vector.multi_reduction <minimumf>, %102, %cst_53 [0] : vector<49x128xf32> to vector<128xf32>
      %107 = vector.shape_cast %106 : vector<128xf32> to vector<1x128xf32>
      %108 = arith.addf %98, %107 : vector<1x128xf32>
      %c9 = arith.constant 9 : index
      %c0_54 = arith.constant 0 : index
      %c0_55 = arith.constant 0 : index
      %109 = vector.load %arg4[%c9, %c0_54, %c0_55] : memref<16x49x1xf32, #tpu.memory_space<vmem>>, vector<1x49x1xf32>
      %110 = vector.shape_cast %109 : vector<1x49x1xf32> to vector<49x1xf32>
      %111 = vector.broadcast %110 : vector<49x1xf32> to vector<49x128xf32>
      %112 = arith.mulf %14, %111 : vector<49x128xf32>
      %cst_56 = arith.constant dense<0xFF800000> : vector<128xf32>
      %113 = vector.multi_reduction <maximumf>, %112, %cst_56 [0] : vector<49x128xf32> to vector<128xf32>
      %114 = vector.shape_cast %113 : vector<128xf32> to vector<1x128xf32>
      %115 = arith.addf %105, %114 : vector<1x128xf32>
      %cst_57 = arith.constant dense<0x7F800000> : vector<128xf32>
      %116 = vector.multi_reduction <minimumf>, %112, %cst_57 [0] : vector<49x128xf32> to vector<128xf32>
      %117 = vector.shape_cast %116 : vector<128xf32> to vector<1x128xf32>
      %118 = arith.addf %108, %117 : vector<1x128xf32>
      %c10 = arith.constant 10 : index
      %c0_58 = arith.constant 0 : index
      %c0_59 = arith.constant 0 : index
      %119 = vector.load %arg4[%c10, %c0_58, %c0_59] : memref<16x49x1xf32, #tpu.memory_space<vmem>>, vector<1x49x1xf32>
      %120 = vector.shape_cast %119 : vector<1x49x1xf32> to vector<49x1xf32>
      %121 = vector.broadcast %120 : vector<49x1xf32> to vector<49x128xf32>
      %122 = arith.mulf %14, %121 : vector<49x128xf32>
      %cst_60 = arith.constant dense<0xFF800000> : vector<128xf32>
      %123 = vector.multi_reduction <maximumf>, %122, %cst_60 [0] : vector<49x128xf32> to vector<128xf32>
      %124 = vector.shape_cast %123 : vector<128xf32> to vector<1x128xf32>
      %125 = arith.addf %115, %124 : vector<1x128xf32>
      %cst_61 = arith.constant dense<0x7F800000> : vector<128xf32>
      %126 = vector.multi_reduction <minimumf>, %122, %cst_61 [0] : vector<49x128xf32> to vector<128xf32>
      %127 = vector.shape_cast %126 : vector<128xf32> to vector<1x128xf32>
      %128 = arith.addf %118, %127 : vector<1x128xf32>
      %c11 = arith.constant 11 : index
      %c0_62 = arith.constant 0 : index
      %c0_63 = arith.constant 0 : index
      %129 = vector.load %arg4[%c11, %c0_62, %c0_63] : memref<16x49x1xf32, #tpu.memory_space<vmem>>, vector<1x49x1xf32>
      %130 = vector.shape_cast %129 : vector<1x49x1xf32> to vector<49x1xf32>
      %131 = vector.broadcast %130 : vector<49x1xf32> to vector<49x128xf32>
      %132 = arith.mulf %14, %131 : vector<49x128xf32>
      %cst_64 = arith.constant dense<0xFF800000> : vector<128xf32>
      %133 = vector.multi_reduction <maximumf>, %132, %cst_64 [0] : vector<49x128xf32> to vector<128xf32>
      %134 = vector.shape_cast %133 : vector<128xf32> to vector<1x128xf32>
      %135 = arith.addf %125, %134 : vector<1x128xf32>
      %cst_65 = arith.constant dense<0x7F800000> : vector<128xf32>
      %136 = vector.multi_reduction <minimumf>, %132, %cst_65 [0] : vector<49x128xf32> to vector<128xf32>
      %137 = vector.shape_cast %136 : vector<128xf32> to vector<1x128xf32>
      %138 = arith.addf %128, %137 : vector<1x128xf32>
      %c12 = arith.constant 12 : index
      %c0_66 = arith.constant 0 : index
      %c0_67 = arith.constant 0 : index
      %139 = vector.load %arg4[%c12, %c0_66, %c0_67] : memref<16x49x1xf32, #tpu.memory_space<vmem>>, vector<1x49x1xf32>
      %140 = vector.shape_cast %139 : vector<1x49x1xf32> to vector<49x1xf32>
      %141 = vector.broadcast %140 : vector<49x1xf32> to vector<49x128xf32>
      %142 = arith.mulf %14, %141 : vector<49x128xf32>
      %cst_68 = arith.constant dense<0xFF800000> : vector<128xf32>
      %143 = vector.multi_reduction <maximumf>, %142, %cst_68 [0] : vector<49x128xf32> to vector<128xf32>
      %144 = vector.shape_cast %143 : vector<128xf32> to vector<1x128xf32>
      %145 = arith.addf %135, %144 : vector<1x128xf32>
      %cst_69 = arith.constant dense<0x7F800000> : vector<128xf32>
      %146 = vector.multi_reduction <minimumf>, %142, %cst_69 [0] : vector<49x128xf32> to vector<128xf32>
      %147 = vector.shape_cast %146 : vector<128xf32> to vector<1x128xf32>
      %148 = arith.addf %138, %147 : vector<1x128xf32>
      %c13 = arith.constant 13 : index
      %c0_70 = arith.constant 0 : index
      %c0_71 = arith.constant 0 : index
      %149 = vector.load %arg4[%c13, %c0_70, %c0_71] : memref<16x49x1xf32, #tpu.memory_space<vmem>>, vector<1x49x1xf32>
      %150 = vector.shape_cast %149 : vector<1x49x1xf32> to vector<49x1xf32>
      %151 = vector.broadcast %150 : vector<49x1xf32> to vector<49x128xf32>
      %152 = arith.mulf %14, %151 : vector<49x128xf32>
      %cst_72 = arith.constant dense<0xFF800000> : vector<128xf32>
      %153 = vector.multi_reduction <maximumf>, %152, %cst_72 [0] : vector<49x128xf32> to vector<128xf32>
      %154 = vector.shape_cast %153 : vector<128xf32> to vector<1x128xf32>
      %155 = arith.addf %145, %154 : vector<1x128xf32>
      %cst_73 = arith.constant dense<0x7F800000> : vector<128xf32>
      %156 = vector.multi_reduction <minimumf>, %152, %cst_73 [0] : vector<49x128xf32> to vector<128xf32>
      %157 = vector.shape_cast %156 : vector<128xf32> to vector<1x128xf32>
      %158 = arith.addf %148, %157 : vector<1x128xf32>
      %c14 = arith.constant 14 : index
      %c0_74 = arith.constant 0 : index
      %c0_75 = arith.constant 0 : index
      %159 = vector.load %arg4[%c14, %c0_74, %c0_75] : memref<16x49x1xf32, #tpu.memory_space<vmem>>, vector<1x49x1xf32>
      %160 = vector.shape_cast %159 : vector<1x49x1xf32> to vector<49x1xf32>
      %161 = vector.broadcast %160 : vector<49x1xf32> to vector<49x128xf32>
      %162 = arith.mulf %14, %161 : vector<49x128xf32>
      %cst_76 = arith.constant dense<0xFF800000> : vector<128xf32>
      %163 = vector.multi_reduction <maximumf>, %162, %cst_76 [0] : vector<49x128xf32> to vector<128xf32>
      %164 = vector.shape_cast %163 : vector<128xf32> to vector<1x128xf32>
      %165 = arith.addf %155, %164 : vector<1x128xf32>
      %cst_77 = arith.constant dense<0x7F800000> : vector<128xf32>
      %166 = vector.multi_reduction <minimumf>, %162, %cst_77 [0] : vector<49x128xf32> to vector<128xf32>
      %167 = vector.shape_cast %166 : vector<128xf32> to vector<1x128xf32>
      %168 = arith.addf %158, %167 : vector<1x128xf32>
      %c15 = arith.constant 15 : index
      %c0_78 = arith.constant 0 : index
      %c0_79 = arith.constant 0 : index
      %169 = vector.load %arg4[%c15, %c0_78, %c0_79] : memref<16x49x1xf32, #tpu.memory_space<vmem>>, vector<1x49x1xf32>
      %170 = vector.shape_cast %169 : vector<1x49x1xf32> to vector<49x1xf32>
      %171 = vector.broadcast %170 : vector<49x1xf32> to vector<49x128xf32>
      %172 = arith.mulf %14, %171 : vector<49x128xf32>
      %cst_80 = arith.constant dense<0xFF800000> : vector<128xf32>
      %173 = vector.multi_reduction <maximumf>, %172, %cst_80 [0] : vector<49x128xf32> to vector<128xf32>
      %174 = vector.shape_cast %173 : vector<128xf32> to vector<1x128xf32>
      %175 = arith.addf %165, %174 : vector<1x128xf32>
      %cst_81 = arith.constant dense<0x7F800000> : vector<128xf32>
      %176 = vector.multi_reduction <minimumf>, %172, %cst_81 [0] : vector<49x128xf32> to vector<128xf32>
      %177 = vector.shape_cast %176 : vector<128xf32> to vector<1x128xf32>
      %178 = arith.addf %168, %177 : vector<1x128xf32>
      %c0_82 = arith.constant 0 : index
      %c0_83 = arith.constant 0 : index
      %179 = vector.load %arg10[%c0_82, %c0_83] : memref<3x128xf32, #tpu.memory_space<vmem>>, vector<1x128xf32>
      tpu.vector_store %arg10[%c0_82, %c0_83], %16 {strides = array<i32>} : memref<3x128xf32, #tpu.memory_space<vmem>>, vector<1x128xf32>,
      %c1_84 = arith.constant 1 : index
      %c0_85 = arith.constant 0 : index
      %180 = vector.load %arg10[%c1_84, %c0_85] : memref<3x128xf32, #tpu.memory_space<vmem>>, vector<1x128xf32>
      tpu.vector_store %arg10[%c1_84, %c0_85], %175 {strides = array<i32>} : memref<3x128xf32, #tpu.memory_space<vmem>>, vector<1x128xf32>,
      %c2_86 = arith.constant 2 : index
      %c0_87 = arith.constant 0 : index
      %181 = vector.load %arg10[%c2_86, %c0_87] : memref<3x128xf32, #tpu.memory_space<vmem>>, vector<1x128xf32>
      tpu.vector_store %arg10[%c2_86, %c0_87], %178 {strides = array<i32>} : memref<3x128xf32, #tpu.memory_space<vmem>>, vector<1x128xf32>,
      %c0_88 = arith.constant 0 : index
      %c0_89 = arith.constant 0 : index
      %182 = vector.load %arg10[%c0_88, %c0_89] : memref<3x128xf32, #tpu.memory_space<vmem>>, vector<3x128xf32>
      %c0_90 = arith.constant 0 : index
      %c0_91 = arith.constant 0 : index
      %183 = vector.load %arg6[%c0_90, %c0_91] : memref<128x8xf32, #tpu.memory_space<vmem>>, vector<128x8xf32>
      %cst_92 = arith.constant dense<0.000000e+00> : vector<3x8xf32>
      %184 = tpu.matmul %182, %183, %cst_92 {dimension_numbers = #tpu.dot_dimension_numbers<[1], [0], [0], [1], [0, 0, 1, 1], [], []>} : vector<3x128xf32>, vector<128x8xf32>, vector<3x8xf32> -> vector<3x8xf32>
      %cst_93 = arith.constant 0.000000e+00 : f32
      %185 = vector.broadcast %cst_93 : f32 to vector<3x8xf32>
      %186 = arith.maximumf %184, %185 : vector<3x8xf32>
      %c0_94 = arith.constant 0 : index
      %c0_95 = arith.constant 0 : index
      %187 = vector.load %arg7[%c0_94, %c0_95] : memref<8x128xf32, #tpu.memory_space<vmem>>, vector<8x128xf32>
      %cst_96 = arith.constant dense<0.000000e+00> : vector<3x128xf32>
      %188 = tpu.matmul %186, %187, %cst_96 {dimension_numbers = #tpu.dot_dimension_numbers<[1], [0], [0], [1], [0, 0, 1, 1], [], []>} : vector<3x8xf32>, vector<8x128xf32>, vector<3x128xf32> -> vector<3x128xf32>
      %cst_97 = arith.constant dense<0.000000e+00> : vector<128xf32>
      %189 = vector.multi_reduction <add>, %188, %cst_97 [0] : vector<3x128xf32> to vector<128xf32>
      %190 = vector.shape_cast %189 : vector<128xf32> to vector<1x128xf32>
      %191 = arith.negf %190 : vector<1x128xf32>
      %192 = math.exp %191 : vector<1x128xf32>
      %cst_98 = arith.constant 1.000000e+00 : f32
      %193 = vector.broadcast %cst_98 : f32 to vector<1x128xf32>
      %194 = arith.addf %193, %192 : vector<1x128xf32>
      %195 = arith.divf %193, %194 : vector<1x128xf32>
      %c0_99 = arith.constant 0 : index
      %c0_100 = arith.constant 0 : index
      %c0_101 = arith.constant 0 : index
      %196 = vector.load %arg8[%c0_99, %c0_100, %c0_101] : memref<1x1x128xf32, #tpu.memory_space<vmem>>, vector<1x1x128xf32>
      %197 = vector.shape_cast %196 : vector<1x1x128xf32> to vector<1x128xf32>
      %198 = vector.shape_cast %195 : vector<1x128xf32> to vector<1x1x128xf32>
      tpu.vector_store %arg8[%c0_99, %c0_100, %c0_101], %198 {strides = array<i32>} : memref<1x1x128xf32, #tpu.memory_space<vmem>>, vector<1x1x128xf32>,
    } else {
    }
    return
  }
  func.func @transform_0(%arg0: i32, %arg1: i32) -> (i32, i32, i32) {
    %c0_i32 = arith.constant 0 : i32
    %c0_i32_0 = arith.constant 0 : i32
    return %arg0, %arg1, %c0_i32 : i32, i32, i32
  }
  func.func @transform_1(%arg0: i32, %arg1: i32) -> (i32, i32) {
    %c0_i32 = arith.constant 0 : i32
    %c0_i32_0 = arith.constant 0 : i32
    return %c0_i32, %arg1 : i32, i32
  }
  func.func @transform_2(%arg0: i32, %arg1: i32) -> (i32, i32, i32) {
    %c0_i32 = arith.constant 0 : i32
    %c0_i32_0 = arith.constant 0 : i32
    %c0_i32_1 = arith.constant 0 : i32
    %c0_i32_2 = arith.constant 0 : i32
    return %c0_i32, %c0_i32_0, %c0_i32_1 : i32, i32, i32
  }
  func.func @transform_3(%arg0: i32, %arg1: i32) -> (i32, i32) {
    %c0_i32 = arith.constant 0 : i32
    %c0_i32_0 = arith.constant 0 : i32
    %c0_i32_1 = arith.constant 0 : i32
    return %c0_i32, %c0_i32_0 : i32, i32
  }
  func.func @transform_4(%arg0: i32, %arg1: i32) -> (i32, i32) {
    %c0_i32 = arith.constant 0 : i32
    %c0_i32_0 = arith.constant 0 : i32
    %c0_i32_1 = arith.constant 0 : i32
    return %c0_i32, %c0_i32_0 : i32, i32
  }
  func.func @transform_5(%arg0: i32, %arg1: i32) -> (i32, i32) {
    %c0_i32 = arith.constant 0 : i32
    %c0_i32_0 = arith.constant 0 : i32
    %c0_i32_1 = arith.constant 0 : i32
    return %c0_i32, %c0_i32_0 : i32, i32
  }
  func.func @transform_6(%arg0: i32, %arg1: i32) -> (i32, i32, i32) {
    %c0_i32 = arith.constant 0 : i32
    %c0_i32_0 = arith.constant 0 : i32
    %c0_i32_1 = arith.constant 0 : i32
    return %arg0, %c0_i32, %c0_i32_0 : i32, i32, i32
  }
}

</mosaic_0001>

<bundles_post_ra>
// kernel: tpu_custom_call.1
= control target key start
LH: loop header
LB: loop body
LE: loop exit
PB: predicated region body
PF: predicated region fallthrough
CT: control target
= control target key end

     0   :  { %s3613_s0 = inlined_call_operand.vmem [shape: bf16[2,256,128], index: 0, kind: input, shape index: {}]   ;;  %s3614_s1 = inlined_call_operand.vmem [shape: f32[49,256], index: 1, kind: input, shape index: {}]   ;;  %s3615_s2 = inlined_call_operand.vmem [shape: f32[16,49,1], index: 2, kind: input, shape index: {}]   ;;  %s3616_s3 = inlined_call_operand.vmem [shape: f32[1,49], index: 3, kind: input, shape index: {}]   ;;  %s3617_s4 = inlined_call_operand.vmem [shape: f32[128,8], index: 4, kind: input, shape index: {}]   ;;  %s3618_s5 = inlined_call_operand.vmem [shape: f32[8,128], index: 5, kind: input, shape index: {}]   ;;  %s3619_s6 = inlined_call_operand.hbm [shape: f32[2,1,128], index: 6, kind: output, shape index: {}]  }
   0x1   :  { %3624 = sst [smem:[#allocation12_spill]] %s3614_s1 }
   0x2   :  { %11 = vsyncpa [#allocation6], 0 }
   0x3   :  { %13 = vsyncpa [#allocation6 + $0x1], 0  ;;  %s2762_s21 = smov 0   ;;  %s2764_s22 = smov 0  }
   0x4   :  { %s2766_s23 = smov 0   ;;  %s2768_s24 = smov 0  }
   0x5   :  { %s2770_s25 = smov 0   ;;  %s2772_s26 = smov 0  }
   0x6   :  { %s2774_s27 = smov 0   ;;  %s2776_s28 = smov 0  }
   0x7   :  { %s2778_s29 = smov 0   ;;  %s2780_s30 = smov 0  }
   0x8 LB: > { %3625 = sst [smem:[#allocation8_spill]] %s2710_s28  ;;  %s2148_s7 = sadd.s32 4294967295, %s2718_s30   ;;  %s2718_s30 = sphi %s2780_s30, %s19_s30   ;;  %s2714_s29 = sphi %s2778_s29, %s3636_s29   ;;  %s2710_s28 = sphi %s2776_s28, %s3635_s28   ;;  %s2706_s27 = sphi %s2774_s27, %s3634_s27   ;;  %s2702_s26 = sphi %s2772_s26, %s3633_s26   ;;  %s2698_s25 = sphi %s2770_s25, %s3641_s25   ;;  %s2694_s24 = sphi %s2768_s24, %s3640_s24   ;;  %s2690_s23 = sphi %s2766_s23, %s3639_s23   ;;  %s2686_s22 = sphi %s2764_s22, %s3638_s22   ;;  %s2682_s21 = sphi %s2762_s21, %s3637_s21  }
   0x9   : > { %3626 = sst [smem:[#allocation9_spill]] %s2714_s29  ;;  %s2149_s8 = sadd.s32 4294967294, %s2718_s30  }
   0xa   : > { %s28_s9 = sadd.s32 1, %s2710_s28  ;;  %s31_s10 = sadd.s32 1, %s2714_s29 }
   0xb   : > { %p29_p0 = scmp.ge.s32.totalorder %s28_s9, 2  ;;  %s66_s11 = sadd.s32 1, %s2698_s25 }
   0xc   : > { %p73_p1 = scmp.ne.s32.totalorder %s2698_s25, %s2694_s24  ;;  %p74_p2 = scmp.eq.s32.totalorder %s2718_s30, 0 }
   0xd   : > { %s3643_s9 = smov (%p29_p0, %s28_s9), 0  ;;  %s3645_s10 = smov (!%p29_p0, %s31_s10), %s2714_s29 }
   0xe   : > { %3627 = sst [smem:[#allocation10_spill]] %s3643_s9  ;;  %s63_s12 = ssub.s32 %s2710_s28, %s3643_s9 }
   0xf   : > { %p2825_p3 = por %p74_p2, %p73_p1  ;;  %p33_p4 = scmp.ge.s32.totalorder %s3645_s10, 2 }
  0x10   : > { %p64_p5 = scmp.eq.s32.totalorder %s63_s12, 0  ;;  %s176_s14 = sadd.s32 1, %s2690_s23 }
  0x11   : > { %p186_p6 = scmp.ne.s32.totalorder %s2690_s23, %s2686_s22  ;;  %s3647_s10 = smov (%p33_p4, %s3645_s10), 0 }
  0x12   : > { %3629 = sst [smem:[#allocation11_spill]] %s3647_s10  ;;  %s173_s16 = ssub.s32 %s2714_s29, %s3647_s10 }
  0x13   : > { %s2835_s15 = scalar_select %p64_p5, %s2698_s25, %s66_s11  }
  0x14   : > { %p187_p7 = scmp.eq.s32.totalorder %s2148_s7, 3  ;;  %p174_p8 = scmp.eq.s32.totalorder %s173_s16, 0 }
  0x15   : > { %p192_p9 = scmp.ne.s32.totalorder %s2686_s22, %s2682_s21  ;;  %p193_p11 = scmp.eq.s32.totalorder %s2149_s8, 3 }
  0x16   : > { %p2841_p10 = por %p187_p7, %p186_p6  ;;  %p2151_p13 = scmp.ge.s32.totalorder %s2718_s30, 4 }
  0x17   : > { %s2846_s18 = scalar_select %p174_p8, %s2690_s23, %s176_s14  }
  0x18   : > { %p2848_p12 = por %p193_p11, %p192_p9  ;;  %221 = sbr.rel (%p2151_p13) target bundleno = 43 (0x2b), region = 32 }
  0x1d   : > { %237 = sbr.rel (!%p2825_p3) target bundleno = 43 (0x2b), region = 40  ;;  %s239_s20 = sand.u32 (%p2825_p3), 1, %s2698_s25  }
  0x1e   : > { %s2152_s7 = sshll.u32 (%p2825_p3), %s2710_s28, 3  ;;  %s2502_s11 = smul.u32 (%p2825_p3), 56, %s239_s20 }
  0x1f   : > { %s3632_s1 = sld [smem:[#allocation12_spill]] (%p2825_p3) }
  0x20   : > { %s241_s14 = scalar_lea.vmem (%p2825_p3), [#allocation4], %s2502_s11 }
  0x25   : > { %s243_s8 = scalar_lea.vmem %s3632_s1, %s2152_s7 }
  0x26   : > { %v284_v0 = vld [vmem:[%s243_s8] sm:$0xff]  ;;  %v286_v1 = vld [vmem:[%s243_s8 + $0x10] sm:$0xff] }
  0x27   : > { %v288_v2 = vld [vmem:[%s243_s8 + $0x20] sm:$0xff]  ;;  %v290_v3 = vld [vmem:[%s243_s8 + $0x30] sm:$0xff]  ;;  %285 = vst [vmem:[%s241_s14] sm:$0xff] %v284_v0  ;;  %287 = vst [vmem:[%s241_s14 + $0x8] sm:$0xff] %v286_v1 }
  0x28   : > { %v292_v4 = vld [vmem:[%s243_s8 + $0x40] sm:$0xff]  ;;  %v294_v5 = vld [vmem:[%s243_s8 + $0x50] sm:$0xff]  ;;  %289 = vst [vmem:[%s241_s14 + $0x10] sm:$0xff] %v288_v2  ;;  %291 = vst [vmem:[%s241_s14 + $0x18] sm:$0xff] %v290_v3 }
  0x29   : > { %293 = vst [vmem:[%s241_s14 + $0x20] sm:$0xff] %v292_v4  ;;  %295 = vst [vmem:[%s241_s14 + $0x28] sm:$0xff] %v294_v5  ;;  %v296_v6 = vld [vmem:[%s243_s8 + $0x60] sm:$0xff] }
  0x2a   : > { %297 = vst [vmem:[%s241_s14 + $0x30] sm:$0xff] %v296_v6 }
  0x2b PF: > { %p2153_p0 = scmp.ge.s32.totalorder %s2718_s30, 1  ;;  %p302_p1 = scmp.lt.s32.totalorder %s2718_s30, 5 }
  0x2d   : > { %p303_p2 = pnand %p2153_p0, %p302_p1 }
  0x2e   : > { %s309_s13 = sand.u32 (!%p303_p2), 1, %s2694_s24   ;;  %s344_s20 = sand.u32 (!%p303_p2), 1, %s2686_s22  }
  0x2f   : > { %306 = sbr.rel (%p303_p2) target bundleno = 1138 (0x472), region = 78  ;;  %s2154_s11 = sshll.u32 (!%p303_p2), %s2702_s26, 4 }
  0x30   : > { %s2503_s7 = smul.u32 (!%p303_p2), 56, %s309_s13  ;;  %p347_p3 = scmp.lt.s32.totalorder (!%p303_p2), %s2706_s27, 1 }
  0x31   : > { %p349_p4 = scmp.lt.s32.totalorder (!%p303_p2), %s2154_s11, 31  ;;  %s2876_s28 = scalar_lea.vmem (!%p303_p2), [#allocation5], %s344_s20 }
  0x32   : > { %s2872_s29 = scalar_lea.vmem (!%p303_p2), [#allocation4], %s2503_s7  ;;  %p2157_p5 = scmp.ne.s32.totalorder (!%p303_p2), %s2702_s26, 0 }
  0x34   : > { %s348_s12 = scalar_select %p347_p3, %s2706_s27, 1 }
  0x35   : > { %s3649_s11 = smov (!%p349_p4, %s2154_s11), 31  ;;  %359 = sbr.rel (%p2157_p5) target bundleno = 63 (0x3f), region = 86 }
  0x36   : > { %s2155_s16 = sshll.u32 %s348_s12, 5 }
  0x37   : > { %s352_s8 = sadd.s32 %s2155_s16, %s3649_s11 }
  0x38   : > { %s2156_s14 = sshll.u32 %s352_s8, 2 }
  0x39   : > { %s2870_s9 = scalar_lea.vmem %s3613_s0, %s2156_s14 }
  0x3a   : > { %v2720_v7 = vmov 0.0  }
  0x3b   : > { %360 = vst [vmem:[#allocation2 + $0x30] sm:$0xff] %v2720_v7  ;;  %361 = vst [vmem:[#allocation2] sm:$0xff] %v2720_v7 }
  0x3c   : > { %362 = vst [vmem:[#allocation2 + $0x18] sm:$0xff] %v2720_v7  ;;  %363 = vst [vmem:[#allocation2 + $0x10] sm:$0xff] %v2720_v7 }
  0x3d   : > { %364 = vst [vmem:[#allocation2 + $0x8] sm:$0xff] %v2720_v7  ;;  %365 = vst [vmem:[#allocation2 + $0x20] sm:$0xff] %v2720_v7 }
  0x3e   : > { %366 = vst [vmem:[#allocation2 + $0x28] sm:$0x1] %v2720_v7 }
  0x3f PF: > { %v2309_v8 = vld [vmem:[%s2870_s9 + $0x38] sm:$0xff]   ;;  %v2308_v9 = vld [vmem:[%s2870_s9 + $0x30] sm:$0xff]   ;;  %v2721_v10 = vmov 0.0   ;;  %vm2722_vm0 = vmmov 0   ;;  %v2307_v14 = vld [vmem:[%s2870_s9 + $0x28] sm:$0xff]   ;;  %p2158_p6 = scmp.ne.s32.totalorder %s2702_s26, 1 }
  0x40   : > { %2360 = vmatprep.subr.mxu0 %v2721_v10  ;;  %v2301_v11 = vunpack.c.l.bf16 %v2309_v8  ;;  %v2302_v12 = vunpack.c.h.bf16 %v2309_v8  ;;  %2470 = vmatprep.subr.mxu1 %v2721_v10  ;;  %v2298_v13 = vunpack.c.h.bf16 %v2308_v9  ;;  %v2297_v15 = vunpack.c.l.bf16 %v2308_v9  ;;  %v2306_v17 = vld [vmem:[%s2870_s9 + $0x20] sm:$0xff]   ;;  %v2305_v20 = vld [vmem:[%s2870_s9 + $0x18] sm:$0xff]   ;;  %v2304_v23 = vld [vmem:[%s2870_s9 + $0x10] sm:$0xff]  }
  0x41   : > { %2392 = vmatprep.mubr.msk.f32.mxu0 %vm2722_vm0, %v2721_v10  ;;  %2404 = vmatprep.mubr.msk.f32.mxu1 %vm2722_vm0, %v2721_v10  ;;  %v2294_v16 = vunpack.c.h.bf16 %v2307_v14  ;;  %v2293_v18 = vunpack.c.l.bf16 %v2307_v14  ;;  %v2290_v19 = vunpack.c.h.bf16 %v2306_v17  ;;  %v2289_v21 = vunpack.c.l.bf16 %v2306_v17  ;;  %v2303_v26 = vld [vmem:[%s2870_s9 + $0x8] sm:$0xff]   ;;  %v2272_v29 = vld [vmem:[%s2870_s9] sm:$0xff]  }
  0x42   : > { %2361 = vmatpush3.msra.mxu0 %v2302_v12  ;;  %2486 = vmatpush3.msra.mxu1 %v2302_v12  ;;  %v2286_v22 = vunpack.c.h.bf16 %v2305_v20  ;;  %v2285_v24 = vunpack.c.l.bf16 %v2305_v20  ;;  %v2282_v25 = vunpack.c.h.bf16 %v2304_v23  ;;  %v2281_v27 = vunpack.c.l.bf16 %v2304_v23  ;;  %v374_v33 = vld [vmem:[%s2872_s29] sm:$0xff]  ;;  %v375_v35 = vld [vmem:[%s2872_s29 + $0x8] sm:$0xff]  ;;  %v376_v37 = vld [vmem:[%s2872_s29 + $0x10] sm:$0xff] }
  0x43   : > { %2362 = vmatprep.subr.mxu0 %v2721_v10  ;;  %2471 = vmatprep.subr.mxu1 %v2721_v10  ;;  %v2278_v28 = vunpack.c.h.bf16 %v2303_v26  ;;  %v2277_v30 = vunpack.c.l.bf16 %v2303_v26  ;;  %v2274_v31 = vunpack.c.h.bf16 %v2272_v29  ;;  %v2273_v32 = vunpack.c.l.bf16 %v2272_v29  ;;  %v378_v34 = vld [vmem:[%s2872_s29 + $0x20] sm:$0xff]  ;;  %v379_v36 = vld [vmem:[%s2872_s29 + $0x28] sm:$0xff]  ;;  %v380_v38 = vld [vmem:[%s2872_s29 + $0x30] sm:$0x1] }
  0x44   : > { %2363 = vmatpush3.msra.mxu0 %v2301_v11  ;;  %2487 = vmatpush3.msra.mxu1 %v2301_v11  ;;  %v377_v39 = vld [vmem:[%s2872_s29 + $0x18] sm:$0xff]  ;;  %v368_v47 = vld [vmem:[#allocation2] sm:$0xff] }
  0x45   : > { %2364 = vmatprep.subr.mxu0 %v2721_v10  ;;  %2472 = vmatprep.subr.mxu1 %v2721_v10  ;;  %v367_v40 = vld [vmem:[#allocation2 + $0x30] sm:$0xff]  ;;  %v371_v41 = vld [vmem:[#allocation2 + $0x8] sm:$0xff]  ;;  %v372_v49 = vld [vmem:[#allocation2 + $0x20] sm:$0xff] }
  0x46   : > { %2365 = vmatpush3.msra.mxu0 %v2298_v13  ;;  %2488 = vmatpush3.msra.mxu1 %v2298_v13  ;;  %v369_v55 = vld [vmem:[#allocation2 + $0x18] sm:$0xff]  ;;  %v373_v57 = vld [vmem:[#allocation2 + $0x28] sm:$0x1]  ;;  %v370_v63 = vld [vmem:[#allocation2 + $0x10] sm:$0xff] }
  0x47   : > { %2366 = vmatprep.subr.mxu0 %v2721_v10  ;;  %2473 = vmatprep.subr.mxu1 %v2721_v10 }
  0x48   : > { %2367 = vmatpush3.msra.mxu0 %v2297_v15  ;;  %2489 = vmatpush3.msra.mxu1 %v2297_v15 }
  0x49   : > { %2368 = vmatprep.subr.mxu0 %v2721_v10  ;;  %2474 = vmatprep.subr.mxu1 %v2721_v10 }
  0x4a   : > { %2369 = vmatpush3.msra.mxu0 %v2294_v16  ;;  %2490 = vmatpush3.msra.mxu1 %v2294_v16 }
  0x4b   : > { %2370 = vmatprep.subr.mxu0 %v2721_v10  ;;  %2475 = vmatprep.subr.mxu1 %v2721_v10 }
  0x4c   : > { %2371 = vmatpush3.msra.mxu0 %v2293_v18  ;;  %2491 = vmatpush3.msra.mxu1 %v2293_v18 }
  0x4d   : > { %2372 = vmatprep.subr.mxu0 %v2721_v10  ;;  %2476 = vmatprep.subr.mxu1 %v2721_v10 }
  0x4e   : > { %2373 = vmatpush3.msra.mxu0 %v2290_v19  ;;  %2492 = vmatpush3.msra.mxu1 %v2290_v19 }
  0x4f   : > { %2374 = vmatprep.subr.mxu0 %v2721_v10  ;;  %2477 = vmatprep.subr.mxu1 %v2721_v10 }
  0x50   : > { %2375 = vmatpush3.msra.mxu0 %v2289_v21  ;;  %2493 = vmatpush3.msra.mxu1 %v2289_v21 }
  0x51   : > { %2376 = vmatprep.subr.mxu0 %v2721_v10  ;;  %2478 = vmatprep.subr.mxu1 %v2721_v10 }
  0x52   : > { %2377 = vmatpush3.msra.mxu0 %v2286_v22  ;;  %2494 = vmatpush3.msra.mxu1 %v2286_v22 }
  0x53   : > { %2378 = vmatprep.subr.mxu0 %v2721_v10  ;;  %2479 = vmatprep.subr.mxu1 %v2721_v10 }
  0x54   : > { %2379 = vmatpush3.msra.mxu0 %v2285_v24  ;;  %2495 = vmatpush3.msra.mxu1 %v2285_v24 }
  0x55   : > { %2380 = vmatprep.subr.mxu0 %v2721_v10  ;;  %2480 = vmatprep.subr.mxu1 %v2721_v10 }
  0x56   : > { %2381 = vmatpush3.msra.mxu0 %v2282_v25  ;;  %2496 = vmatpush3.msra.mxu1 %v2282_v25 }
  0x57   : > { %2382 = vmatprep.subr.mxu0 %v2721_v10  ;;  %2481 = vmatprep.subr.mxu1 %v2721_v10 }
  0x58   : > { %2383 = vmatpush3.msra.mxu0 %v2281_v27  ;;  %2497 = vmatpush3.msra.mxu1 %v2281_v27 }
  0x59   : > { %2384 = vmatprep.subr.mxu0 %v2721_v10  ;;  %2482 = vmatprep.subr.mxu1 %v2721_v10 }
  0x5a   : > { %2385 = vmatpush3.msra.mxu0 %v2278_v28  ;;  %2498 = vmatpush3.msra.mxu1 %v2278_v28 }
  0x5b   : > { %2386 = vmatprep.subr.mxu0 %v2721_v10  ;;  %2483 = vmatprep.subr.mxu1 %v2721_v10 }
  0x5c   : > { %2387 = vmatpush3.msra.mxu0 %v2277_v30  ;;  %2499 = vmatpush3.msra.mxu1 %v2277_v30 }
  0x5d   : > { %2388 = vmatprep.subr.mxu0 %v2721_v10  ;;  %2484 = vmatprep.subr.mxu1 %v2721_v10 }
  0x5e   : > { %2389 = vmatpush3.msra.mxu0 %v2274_v31  ;;  %2500 = vmatpush3.msra.mxu1 %v2274_v31 }
  0x5f   : > { %2390 = vmatprep.subr.mxu0 %v2721_v10  ;;  %2485 = vmatprep.subr.mxu1 %v2721_v10 }
  0x60   : > { %2391 = vmatpush3.msra.mxu0 %v2273_v32  ;;  %2501 = vmatpush3.msra.mxu1 %v2273_v32 }
  0x61   : > { %2393 = vmatmul.mubr.f32.vlgmr.msra.gmra.mxu0 %v374_v33  ;;  %2405 = vmatmul.mubr.f32.vlgmr.msra.gmra.mxu1 %v378_v34 }
  0x62   : > { %2395 = vmatprep.mubr.msk.f32.mxu0 %vm2722_vm0, %v2721_v10  ;;  %2407 = vmatprep.mubr.msk.f32.mxu1 %vm2722_vm0, %v2721_v10 }
  0x65   : > { %2396 = vmatmul.mubr.f32.gmra.mxu0 %v375_v35  ;;  %2408 = vmatmul.mubr.f32.gmra.mxu1 %v379_v36 }
  0x66   : > { %2398 = vmatprep.mubr.msk.f32.mxu0 %vm2722_vm0, %v2721_v10  ;;  %2410 = vmatprep.mubr.msk.f32.mxu1 %vm2722_vm0, %v2721_v10 }
  0x69   : > { %2399 = vmatmul.mubr.f32.gmra.mxu0 %v376_v37  ;;  %2411 = vmatmul.mubr.f32.gmra.mxu1 %v380_v38 }
  0x6a   : > { %2401 = vmatprep.mubr.msk.f32.mxu0 %vm2722_vm0, %v2721_v10 }
  0x6d   : > { %2402 = vmatmul.mubr.f32.gmra.mxu0 %v377_v39 }
 0x121   : > { %v479_v42 = vpop.f32.mrf.mxu0  ;;  %v499_v43 = vpop.f32.mrf.mxu1 }
 0x122   : > { %v513_v44 = vadd.f32 %v479_v42, %v367_v40  ;;  %v517_v45 = vadd.f32 %v499_v43, %v371_v41 }
 0x123   : > { %v2394_v46 = vpop.f32.mrf.mxu0  ;;  %v2406_v48 = vpop.f32.mrf.mxu1 }
 0x124   : > { %520 = vst [vmem:[#allocation2 + $0x30] sm:$0xff] %v513_v44  ;;  %524 = vst [vmem:[#allocation2 + $0x8] sm:$0xff] %v517_v45 }
 0x125   : > { %v484_v50 = vpop.f32.mrf.mxu0  ;;  %v504_v51 = vpop.f32.mrf.mxu1 }
 0x126   : > { %v514_v52 = vadd.f32 %v484_v50, %v368_v47  ;;  %v518_v53 = vadd.f32 %v504_v51, %v372_v49 }
 0x127   : > { %v2397_v54 = vpop.f32.mrf.mxu0  ;;  %v2409_v56 = vpop.f32.mrf.mxu1 }
 0x128   : > { %521 = vst [vmem:[#allocation2] sm:$0xff] %v514_v52  ;;  %525 = vst [vmem:[#allocation2 + $0x20] sm:$0xff] %v518_v53 }
 0x129   : > { %v489_v58 = vpop.f32.mrf.mxu0  ;;  %v509_v59 = vpop.f32.mrf.mxu1 }
 0x12a   : > { %v515_v60 = vadd.f32 %v489_v58, %v369_v55  ;;  %v519_v61 = vadd.f32 %v509_v59, %v373_v57 }
 0x12b   : > { %v2400_v62 = vpop.f32.mrf.mxu0  ;;  %v2412_v0 = vpop.f32.mrf.mxu1 }
 0x12c   : > { %522 = vst [vmem:[#allocation2 + $0x18] sm:$0xff] %v515_v60  ;;  %526 = vst [vmem:[#allocation2 + $0x28] sm:$0x1] %v519_v61  ;;  %530 = sbr.rel (%p2158_p6) target bundleno = 1115 (0x45b), region = 90 }
 0x12d   : > { %v494_v1 = vpop.f32.mrf.mxu0 }
 0x12e   : > { %v516_v2 = vadd.f32 %v494_v1, %v370_v63 }
 0x12f   : > { %v2403_v3 = vpop.f32.mrf.mxu0 }
 0x130   : > { %523 = vst [vmem:[#allocation2 + $0x10] sm:$0xff] %v516_v2 }
 0x131   : > { %v623_v4 = vld [vmem:[%s3615_s2 + $0x30] sm:$0x1]  ;;  %v617_v5 = vld [vmem:[%s3615_s2] sm:$0xff]  ;;  %v2723_v6 = vmov 0   ;;  %v2167_v7 = vld [vmem:[%s3615_s2 + $0x68] sm:$0x1] }
 0x132   : > { %2598 = vset.pattern.permute.xlu1 %v2723_v6  ;;  %2597 = vset.pattern.permute.xlu0 %v2723_v6  ;;  %v618_v8 = vld [vmem:[%s3615_s2 + $0x8] sm:$0xff]  ;;  %v619_v9 = vld [vmem:[%s3615_s2 + $0x10] sm:$0xff]  ;;  %v621_v10 = vld [vmem:[%s3615_s2 + $0x20] sm:$0xff]  ;;  %vm543_vm1 = vcmask 1040384   ;;  %v2724_v24 = vmov 0.0   ;;  %vm2725_vm2 = vmmov 0  }
 0x133   : > { %656 = vperm.xlu0 %2597, %v623_v4   ;;  %626 = vperm.xlu1 %2598, %v617_v5   ;;  %v622_v11 = vld [vmem:[%s3615_s2 + $0x28] sm:$0xff]  ;;  %v2161_v12 = vld [vmem:[%s3615_s2 + $0x38] sm:$0xff]  ;;  %v2162_v13 = vld [vmem:[%s3615_s2 + $0x40] sm:$0xff]  ;;  %vm539_vm3 = vcmask 400384   ;;  %vm1956_vm4 = vcmask 64512   ;;  %vm2030_vm5 = vcmask 1042432  }
 0x134   : > { %v2163_v14 = vld [vmem:[%s3615_s2 + $0x48] sm:$0xff]  ;;  %v2165_v15 = vld [vmem:[%s3615_s2 + $0x58] sm:$0xff]  ;;  %v2166_v16 = vld [vmem:[%s3615_s2 + $0x60] sm:$0xff]  ;;  %2413 = vmatprep.subr.mxu0 %v2724_v24  ;;  %2430 = vmatprep.subr.mxu1 %v2724_v24 }
 0x135   : > { %v2174_v17 = vld [vmem:[%s3615_s2 + $0xa0] sm:$0x1]  ;;  %v620_v18 = vld [vmem:[%s3615_s2 + $0x18] sm:$0xff]  ;;  %v2164_v19 = vld [vmem:[%s3615_s2 + $0x50] sm:$0xff]  ;;  %2427 = vmatprep.mubr.msk.f32.mxu0 %vm2725_vm2, %v2724_v24  ;;  %2462 = vmatprep.mubr.msk.f32.mxu1 %vm2725_vm2, %v2724_v24 }
 0x136   : > { %v2168_v20 = vld [vmem:[%s3615_s2 + $0x70] sm:$0xff]  ;;  %v2169_v21 = vld [vmem:[%s3615_s2 + $0x78] sm:$0xff]  ;;  %v2170_v22 = vld [vmem:[%s3615_s2 + $0x80] sm:$0xff] }
 0x137   : > { %734 = vperm.xlu0 %2597, %v2167_v7   ;;  %631 = vperm.xlu1 %2598, %v618_v8   ;;  %v2995_v23 = vld [vmem:[#allocation2 + $0x28] sm:$0x1]  ;;  %v2172_v25 = vld [vmem:[%s3615_s2 + $0x90] sm:$0xff]  ;;  %v2173_v26 = vld [vmem:[%s3615_s2 + $0x98] sm:$0xff] }
 0x138   : > { %2414 = vmatpush3.msk.msra.mxu0 %vm543_vm1, %v2995_v23  ;;  %v3007_v27 = vld [vmem:[#allocation2 + $0x20] sm:$0xff]  ;;  %v3012_v28 = vld [vmem:[#allocation2 + $0x8] sm:$0xff]  ;;  %v2181_v29 = vld [vmem:[%s3615_s2 + $0xd8] sm:$0x1] }
 0x139   : > { %2415 = vmatprep.subr.mxu0 %v2724_v24  ;;  %v2171_v30 = vld [vmem:[%s3615_s2 + $0x88] sm:$0xff]  ;;  %v3021_v31 = vld [vmem:[#allocation2 + $0x10] sm:$0xff]  ;;  %v3031_v34 = vld [vmem:[#allocation2 + $0x18] sm:$0xff] }
 0x13a   : > { %2416 = vmatpush3.msra.mxu0 %v3007_v27  ;;  %v2175_v32 = vld [vmem:[%s3615_s2 + $0xa8] sm:$0xff]  ;;  %v2176_v33 = vld [vmem:[%s3615_s2 + $0xb0] sm:$0xff]  ;;  %v3038_v35 = vld [vmem:[#allocation2] sm:$0xff] }
 0x13b   : > { %636 = vperm.xlu0 %2597, %v619_v9   ;;  %646 = vperm.xlu1 %2598, %v621_v10   ;;  %v2177_v36 = vld [vmem:[%s3615_s2 + $0xb8] sm:$0xff]  ;;  %v2179_v37 = vld [vmem:[%s3615_s2 + $0xc8] sm:$0xff]  ;;  %v3049_v38 = vld [vmem:[#allocation2 + $0x30] sm:$0xff] }
 0x13c   : > { %2417 = vmatprep.subr.mxu0 %v2724_v24  ;;  %v538_v39 = vld [vmem:[%s3616_s3] sm:$0x1]  ;;  %v2180_v40 = vld [vmem:[%s3615_s2 + $0xd0] sm:$0xff]  ;;  %v2183_v44 = vld [vmem:[%s3615_s2 + $0xe8] sm:$0xff] }
 0x13d   : > { %2418 = vmatpush3.msra.mxu0 %v3012_v28  ;;  %v2188_v41 = vld [vmem:[%s3615_s2 + $0x110] sm:$0x1]  ;;  %v2178_v42 = vld [vmem:[%s3615_s2 + $0xc0] sm:$0xff]  ;;  %v2187_v47 = vld [vmem:[%s3615_s2 + $0x108] sm:$0xff] }
 0x13e   : > { %2419 = vmatprep.subr.mxu0 %v2724_v24  ;;  %v2182_v43 = vld [vmem:[%s3615_s2 + $0xe0] sm:$0xff]  ;;  %v2184_v45 = vld [vmem:[%s3615_s2 + $0xf0] sm:$0xff]  ;;  %v2195_v48 = vld [vmem:[%s3615_s2 + $0x148] sm:$0x1] }
 0x13f   : > { %651 = vperm.xlu0 %2597, %v622_v11   ;;  %704 = vperm.xlu1 %2598, %v2161_v12   ;;  %v2186_v46 = vld [vmem:[%s3615_s2 + $0x100] sm:$0xff]  ;;  %v2185_v49 = vld [vmem:[%s3615_s2 + $0xf8] sm:$0xff]  ;;  %v2191_v52 = vld [vmem:[%s3615_s2 + $0x128] sm:$0xff] }
 0x140   : > { %2420 = vmatpush3.msra.mxu0 %v3021_v31  ;;  %v2189_v50 = vld [vmem:[%s3615_s2 + $0x118] sm:$0xff]  ;;  %v2190_v51 = vld [vmem:[%s3615_s2 + $0x120] sm:$0xff]  ;;  %v2192_v56 = vld [vmem:[%s3615_s2 + $0x130] sm:$0xff] }
 0x141   : > { %2421 = vmatprep.subr.mxu0 %v2724_v24  ;;  %v2193_v53 = vld [vmem:[%s3615_s2 + $0x138] sm:$0xff]  ;;  %v2194_v54 = vld [vmem:[%s3615_s2 + $0x140] sm:$0xff]  ;;  %v2196_v57 = vld [vmem:[%s3615_s2 + $0x150] sm:$0xff] }
 0x142   : > { %2422 = vmatpush3.msra.mxu0 %v3031_v34  ;;  %v2202_v55 = vld [vmem:[%s3615_s2 + $0x180] sm:$0x1]  ;;  %v2197_v58 = vld [vmem:[%s3615_s2 + $0x158] sm:$0xff]  ;;  %v2200_v60 = vld [vmem:[%s3615_s2 + $0x170] sm:$0xff] }
 0x143   : > { %709 = vperm.xlu0 %2597, %v2162_v13   ;;  %714 = vperm.xlu1 %2598, %v2163_v14   ;;  %v2198_v59 = vld [vmem:[%s3615_s2 + $0x160] sm:$0xff]  ;;  %v2201_v61 = vld [vmem:[%s3615_s2 + $0x178] sm:$0xff]  ;;  %v2199_v63 = vld [vmem:[%s3615_s2 + $0x168] sm:$0xff] }
 0x144   : > { %2423 = vmatprep.subr.mxu0 %v2724_v24  ;;  %v2209_v62 = vld [vmem:[%s3615_s2 + $0x1b8] sm:$0x1]  ;;  %v2203_v0 = vld [vmem:[%s3615_s2 + $0x188] sm:$0xff]  ;;  %v2204_v1 = vld [vmem:[%s3615_s2 + $0x190] sm:$0xff] }
 0x145   : > { %2424 = vmatpush3.msra.mxu0 %v3038_v35  ;;  %v2205_v2 = vld [vmem:[%s3615_s2 + $0x198] sm:$0xff]  ;;  %v2207_v3 = vld [vmem:[%s3615_s2 + $0x1a8] sm:$0xff]  ;;  %v2208_v4 = vld [vmem:[%s3615_s2 + $0x1b0] sm:$0xff] }
 0x146   : > { %2425 = vmatprep.subr.mxu0 %v2724_v24  ;;  %v2216_v5 = vld [vmem:[%s3615_s2 + $0x1f0] sm:$0x1]  ;;  %v2206_v6 = vld [vmem:[%s3615_s2 + $0x1a0] sm:$0xff]  ;;  %v2211_v8 = vld [vmem:[%s3615_s2 + $0x1c8] sm:$0xff] }
 0x147   : > { %724 = vperm.xlu0 %2597, %v2165_v15   ;;  %729 = vperm.xlu1 %2598, %v2166_v16   ;;  %v2210_v7 = vld [vmem:[%s3615_s2 + $0x1c0] sm:$0xff]  ;;  %v2212_v9 = vld [vmem:[%s3615_s2 + $0x1d0] sm:$0xff]  ;;  %v2215_v11 = vld [vmem:[%s3615_s2 + $0x1e8] sm:$0xff] }
 0x148   : > { %2426 = vmatpush3.msra.mxu0 %v3049_v38  ;;  %v2214_v10 = vld [vmem:[%s3615_s2 + $0x1e0] sm:$0xff]  ;;  %v2223_v12 = vld [vmem:[%s3615_s2 + $0x228] sm:$0x1]  ;;  %v2213_v13 = vld [vmem:[%s3615_s2 + $0x1d8] sm:$0xff] }
 0x149   : > { %2428 = vmatmul.mubr.msk.f32.vlgmr.msra.gmra.mxu0 %vm539_vm3, %v538_v39  ;;  %2465 = vmatprep.subr.mxu0 %v2724_v24  ;;  %v2217_v16 = vld [vmem:[%s3615_s2 + $0x1f8] sm:$0xff] }
 0x14a   : > { %2467 = vmatprep.mubr.msk.f32.mxu0 %vm2725_vm2, %v2724_v24 }
 0x14b   : > { %812 = vperm.xlu0 %2597, %v2174_v17   ;;  %641 = vperm.xlu1 %2598, %v620_v18   ;;  %v2218_v17 = vld [vmem:[%s3615_s2 + $0x200] sm:$0xff] }
 0x14f   : > { %719 = vperm.xlu0 %2597, %v2164_v19   ;;  %782 = vperm.xlu1 %2598, %v2168_v20   ;;  %v2219_v20 = vld [vmem:[%s3615_s2 + $0x208] sm:$0xff] }
 0x153   : > { %787 = vperm.xlu0 %2597, %v2169_v21   ;;  %792 = vperm.xlu1 %2598, %v2170_v22   ;;  %v2221_v21 = vld [vmem:[%s3615_s2 + $0x218] sm:$0xff] }
 0x157   : > { %802 = vperm.xlu0 %2597, %v2172_v25   ;;  %807 = vperm.xlu1 %2598, %v2173_v26   ;;  %v2222_v26 = vld [vmem:[%s3615_s2 + $0x220] sm:$0xff] }
 0x15b   : > { %890 = vperm.xlu0 %2597, %v2181_v29   ;;  %797 = vperm.xlu1 %2598, %v2171_v30   ;;  %v2230_v29 = vld [vmem:[%s3615_s2 + $0x260] sm:$0x1] }
 0x15f   : > { %860 = vperm.xlu0 %2597, %v2175_v32   ;;  %865 = vperm.xlu1 %2598, %v2176_v33   ;;  %v2220_v33 = vld [vmem:[%s3615_s2 + $0x210] sm:$0xff] }
 0x163   : > { %870 = vperm.xlu0 %2597, %v2177_v36   ;;  %880 = vperm.xlu1 %2598, %v2179_v37   ;;  %v2224_v36 = vld [vmem:[%s3615_s2 + $0x230] sm:$0xff] }
 0x167   : > { %885 = vperm.xlu0 %2597, %v2180_v40   ;;  %968 = vperm.xlu1 %2598, %v2188_v41   ;;  %v2225_v41 = vld [vmem:[%s3615_s2 + $0x238] sm:$0xff] }
 0x16b   : > { %875 = vperm.xlu0 %2597, %v2178_v42   ;;  %938 = vperm.xlu1 %2598, %v2182_v43  }
 0x16f   : > { %943 = vperm.xlu0 %2597, %v2183_v44   ;;  %948 = vperm.xlu1 %2598, %v2184_v45   ;;  %v2226_v44 = vld [vmem:[%s3615_s2 + $0x240] sm:$0xff] }
 0x173   : > { %958 = vperm.xlu0 %2597, %v2186_v46   ;;  %963 = vperm.xlu1 %2598, %v2187_v47  }
 0x177   : > { %1046 = vperm.xlu0 %2597, %v2195_v48   ;;  %953 = vperm.xlu1 %2598, %v2185_v49  }
 0x17b   : > { %1016 = vperm.xlu0 %2597, %v2189_v50   ;;  %1021 = vperm.xlu1 %2598, %v2190_v51  }
 0x17f   : > { %1026 = vperm.xlu0 %2597, %v2191_v52   ;;  %1036 = vperm.xlu1 %2598, %v2193_v53   ;;  %v2228_v53 = vld [vmem:[%s3615_s2 + $0x250] sm:$0xff] }
 0x183   : > { %1041 = vperm.xlu0 %2597, %v2194_v54   ;;  %1124 = vperm.xlu1 %2598, %v2202_v55  }
 0x187   : > { %1031 = vperm.xlu0 %2597, %v2192_v56   ;;  %1094 = vperm.xlu1 %2598, %v2196_v57  }
 0x18b   : > { %1099 = vperm.xlu0 %2597, %v2197_v58   ;;  %1104 = vperm.xlu1 %2598, %v2198_v59   ;;  %v2229_v58 = vld [vmem:[%s3615_s2 + $0x258] sm:$0xff] }
 0x18f   : > { %1114 = vperm.xlu0 %2597, %v2200_v60   ;;  %1119 = vperm.xlu1 %2598, %v2201_v61  }
 0x193   : > { %1202 = vperm.xlu0 %2597, %v2209_v62   ;;  %1109 = vperm.xlu1 %2598, %v2199_v63  }
 0x197   : > { %1172 = vperm.xlu0 %2597, %v2203_v0   ;;  %1177 = vperm.xlu1 %2598, %v2204_v1  }
 0x19b   : > { %1182 = vperm.xlu0 %2597, %v2205_v2   ;;  %1192 = vperm.xlu1 %2598, %v2207_v3  }
 0x19f   : > { %1197 = vperm.xlu0 %2597, %v2208_v4   ;;  %1280 = vperm.xlu1 %2598, %v2216_v5  }
 0x1a3   : > { %1187 = vperm.xlu0 %2597, %v2206_v6   ;;  %1250 = vperm.xlu1 %2598, %v2210_v7  }
 0x1a7   : > { %1255 = vperm.xlu0 %2597, %v2211_v8   ;;  %1260 = vperm.xlu1 %2598, %v2212_v9   ;;  %v2237_v9 = vld [vmem:[%s3615_s2 + $0x298] sm:$0x1] }
 0x1ab   : > { %1270 = vperm.xlu0 %2597, %v2214_v10   ;;  %1275 = vperm.xlu1 %2598, %v2215_v11  }
 0x1ae   : > { %v657_v14 = vpop.permute.xlu0 %656  ;;  %v627_v15 = vpop.permute.xlu1 %626 }
 0x1af   : > { %1358 = vperm.xlu0 %2597, %v2223_v12   ;;  %1265 = vperm.xlu1 %2598, %v2213_v13   ;;  %v665_v40 = vmul.f32 %v657_v14, %v2995_v23  ;;  %v659_v50 = vmul.f32 %v627_v15, %v3049_v38  ;;  %v2227_v13 = vld [vmem:[%s3615_s2 + $0x248] sm:$0xff] }
 0x1b1   : > { %v668_v49 = vsel %vm543_vm1, %v665_v40, -inf  ;;  %v682_v54 = vsel %vm543_vm1, %v665_v40, inf }
 0x1b2   : > { %v735_v18 = vpop.permute.xlu0 %734  ;;  %v632_v19 = vpop.permute.xlu1 %631 }
 0x1b3   : > { %1328 = vperm.xlu0 %2597, %v2217_v16   ;;  %1333 = vperm.xlu1 %2598, %v2218_v17   ;;  %v660_v47 = vmul.f32 %v632_v19, %v3038_v35  ;;  %v743_v55 = vmul.f32 %v735_v18, %v2995_v23 }
 0x1b5   : > { %v746_v14 = vsel %vm543_vm1, %v743_v55, -inf  ;;  %v760_v15 = vsel %vm543_vm1, %v743_v55, inf }
 0x1b6   : > { %v637_v22 = vpop.permute.xlu0 %636  ;;  %v647_v25 = vpop.permute.xlu1 %646 }
 0x1b7   : > { %1338 = vperm.xlu0 %2597, %v2219_v20   ;;  %1348 = vperm.xlu1 %2598, %v2221_v21   ;;  %v661_v42 = vmul.f32 %v637_v22, %v3031_v34  ;;  %v663_v48 = vmul.f32 %v647_v25, %v3012_v28 }
 0x1b9   : > { %v669_v56 = vmax.f32 %v661_v42, %v668_v49  ;;  %v683_v59 = vmin.f32 %v661_v42, %v682_v54  ;;  %v666_v1 = vmax.f32 %v659_v50, %v663_v48  ;;  %v680_v2 = vmin.f32 %v659_v50, %v663_v48  ;;  %v2235_v49 = vld [vmem:[%s3615_s2 + $0x288] sm:$0xff] }
 0x1ba   : > { %v652_v30 = vpop.permute.xlu0 %651  ;;  %v705_v32 = vpop.permute.xlu1 %704 }
 0x1bb   : > { %1353 = vperm.xlu0 %2597, %v2222_v26   ;;  %1436 = vperm.xlu1 %2598, %v2230_v29   ;;  %v664_v43 = vmul.f32 %v652_v30, %v3007_v27  ;;  %v737_v61 = vmul.f32 %v705_v32, %v3049_v38  ;;  %v2231_v29 = vld [vmem:[%s3615_s2 + $0x268] sm:$0xff] }
 0x1bd   : > { %v667_v57 = vmax.f32 %v660_v47, %v664_v43  ;;  %v681_v60 = vmin.f32 %v660_v47, %v664_v43 }
 0x1be   : > { %v710_v37 = vpop.permute.xlu0 %709  ;;  %v715_v39 = vpop.permute.xlu1 %714 }
 0x1bf   : > { %1343 = vperm.xlu0 %2597, %v2220_v33   ;;  %1406 = vperm.xlu1 %2598, %v2224_v36   ;;  %v738_v62 = vmul.f32 %v710_v37, %v3038_v35  ;;  %v739_v3 = vmul.f32 %v715_v39, %v3031_v34  ;;  %v670_v10 = vmax.f32 %v666_v1, %v667_v57  ;;  %v2232_v37 = vld [vmem:[%s3615_s2 + $0x270] sm:$0xff] }
 0x1c0   : > { %v684_v16 = vmin.f32 %v680_v2, %v681_v60 }
 0x1c1   : > { %v747_v19 = vmax.f32 %v739_v3, %v746_v14  ;;  %v761_v20 = vmin.f32 %v739_v3, %v760_v15  ;;  %v2234_v14 = vld [vmem:[%s3615_s2 + $0x280] sm:$0xff] }
 0x1c2   : > { %v725_v45 = vpop.permute.xlu0 %724  ;;  %v730_v46 = vpop.permute.xlu1 %729 }
 0x1c3   : > { %1411 = vperm.xlu0 %2597, %v2225_v41   ;;  %v741_v51 = vmul.f32 %v725_v45, %v3012_v28  ;;  %v742_v52 = vmul.f32 %v730_v46, %v3007_v27  ;;  %1416 = vperm.xlu1 %2598, %v2226_v44   ;;  %v2233_v44 = vld [vmem:[%s3615_s2 + $0x278] sm:$0xff] }
 0x1c5   : > { %v744_v5 = vmax.f32 %v737_v61, %v741_v51  ;;  %v758_v6 = vmin.f32 %v737_v61, %v741_v51  ;;  %v745_v7 = vmax.f32 %v738_v62, %v742_v52  ;;  %v759_v8 = vmin.f32 %v738_v62, %v742_v52 }
 0x1c6   : > { %v813_v63 = vpop.permute.xlu0 %812  ;;  %v642_v0 = vpop.permute.xlu1 %641 }
 0x1c7   : > { %v662_v4 = vmul.f32 %v642_v0, %v3021_v31  ;;  %1426 = vperm.xlu0 %2597, %v2228_v53   ;;  %1431 = vperm.xlu1 %2598, %v2229_v58   ;;  %v748_v25 = vmax.f32 %v744_v5, %v745_v7  ;;  %v762_v26 = vmin.f32 %v758_v6, %v759_v8  ;;  %v2244_v0 = vld [vmem:[%s3615_s2 + $0x2d0] sm:$0x1] }
 0x1c8   : > { %v821_v43 = vmul.f32 %v813_v63, %v2995_v23 }
 0x1c9   : > { %v671_v11 = vmax.f32 %v669_v56, %v662_v4  ;;  %v685_v12 = vmin.f32 %v683_v59, %v662_v4  ;;  %v2236_v59 = vld [vmem:[%s3615_s2 + $0x290] sm:$0xff] }
 0x1ca   : > { %v720_v17 = vpop.permute.xlu0 %719  ;;  %v783_v18 = vpop.permute.xlu1 %782  ;;  %v824_v63 = vsel %vm543_vm1, %v821_v43, -inf }
 0x1cb   : > { %v672_v21 = vmax.f32 %v670_v10, %v671_v11  ;;  %v740_v22 = vmul.f32 %v720_v17, %v3021_v31  ;;  %1514 = vperm.xlu0 %2597, %v2237_v9   ;;  %1421 = vperm.xlu1 %2598, %v2227_v13   ;;  %v686_v32 = vmin.f32 %v684_v16, %v685_v12  ;;  %v838_v9 = vsel %vm543_vm1, %v821_v43, inf  ;;  %v2238_v16 = vld [vmem:[%s3615_s2 + $0x2a0] sm:$0xff] }
 0x1cc   : > { %v815_v55 = vmul.f32 %v783_v18, %v3049_v38 }
 0x1cd   : > { %v673_v30 = vrot.slane %v672_v21, 4  ;;  %v749_v33 = vmax.f32 %v747_v19, %v740_v22  ;;  %v763_v36 = vmin.f32 %v761_v20, %v740_v22  ;;  %v687_v46 = vrot.slane %v686_v32, 4 }
 0x1ce   : > { %v788_v39 = vpop.permute.xlu0 %787  ;;  %v793_v40 = vpop.permute.xlu1 %792 }
 0x1cf   : > { %v750_v41 = vmax.f32 %v748_v25, %v749_v33  ;;  %v764_v42 = vmin.f32 %v762_v26, %v763_v36  ;;  %1484 = vperm.xlu0 %2597, %v2231_v29   ;;  %1489 = vperm.xlu1 %2598, %v2232_v37   ;;  %v674_v45 = vmax.f32 %v672_v21, %v673_v30  ;;  %v2240_v36 = vld [vmem:[%s3615_s2 + $0x2b0] sm:$0xff] }
 0x1d0   : > { %v817_v54 = vmul.f32 %v793_v40, %v3031_v34  ;;  %v816_v56 = vmul.f32 %v788_v39, %v3038_v35  ;;  %v688_v61 = vmin.f32 %v686_v32, %v687_v46  ;;  %v2239_v32 = vld [vmem:[%s3615_s2 + $0x2a8] sm:$0xff] }
 0x1d1   : > { %v751_v47 = vrot.slane %v750_v41, 4  ;;  %v765_v48 = vrot.slane %v764_v42, 4  ;;  %v675_v60 = vrot.slane %v674_v45, 2 }
 0x1d2   : > { %v803_v50 = vpop.permute.xlu0 %802  ;;  %v808_v51 = vpop.permute.xlu1 %807  ;;  %v825_v8 = vmax.f32 %v817_v54, %v824_v63  ;;  %v839_v10 = vmin.f32 %v817_v54, %v838_v9  ;;  %v689_v15 = vrot.slane %v688_v61, 2  ;;  %v2241_v9 = vld [vmem:[%s3615_s2 + $0x2b8] sm:$0xff] }
 0x1d3   : > { %v752_v52 = vmax.f32 %v750_v41, %v751_v47  ;;  %v766_v53 = vmin.f32 %v764_v42, %v765_v48  ;;  %1494 = vperm.xlu0 %2597, %v2233_v44   ;;  %v819_v57 = vmul.f32 %v803_v50, %v3012_v28  ;;  %v820_v58 = vmul.f32 %v808_v51, %v3007_v27 }
 0x1d4   : > { %1504 = vperm.xlu1 %2598, %v2235_v49   ;;  %v676_v17 = vmax.f32 %v674_v45, %v675_v60  ;;  %v690_v33 = vmin.f32 %v688_v61, %v689_v15 }
 0x1d5   : > { %v753_v62 = vrot.slane %v752_v52, 2  ;;  %v822_v1 = vmax.f32 %v815_v55, %v819_v57  ;;  %v836_v2 = vmin.f32 %v815_v55, %v819_v57  ;;  %v823_v3 = vmax.f32 %v816_v56, %v820_v58  ;;  %v2243_v57 = vld [vmem:[%s3615_s2 + $0x2c8] sm:$0xff] }
 0x1d6   : > { %v837_v4 = vmin.f32 %v816_v56, %v820_v58  ;;  %v891_v5 = vpop.permute.xlu0 %890  ;;  %v798_v6 = vpop.permute.xlu1 %797  ;;  %v767_v7 = vrot.slane %v766_v53, 2  ;;  %v677_v37 = vrot.slane %v676_v17, 1  ;;  %v691_v58 = vrot.slane %v690_v33, 1 }
 0x1d7   : > { %1509 = vperm.xlu0 %2597, %v2236_v59   ;;  %v826_v11 = vmax.f32 %v822_v1, %v823_v3  ;;  %v818_v13 = vmul.f32 %v798_v6, %v3021_v31  ;;  %v754_v18 = vmax.f32 %v752_v52, %v753_v62  ;;  %v899_v26 = vmul.f32 %v891_v5, %v2995_v23  ;;  %v2242_v52 = vld [vmem:[%s3615_s2 + $0x2c0] sm:$0xff]  ;;  %v2251_v5 = vld [vmem:[%s3615_s2 + $0x308] sm:$0x1] }
 0x1d8   : > { %v840_v12 = vmin.f32 %v836_v2, %v837_v4  ;;  %1592 = vperm.xlu1 %2598, %v2244_v0   ;;  %v768_v25 = vmin.f32 %v766_v53, %v767_v7  ;;  %v678_v6 = vmax.f32 %v676_v17, %v677_v37 }
 0x1d9   : > { %v827_v19 = vmax.f32 %v825_v8, %v818_v13  ;;  %v841_v20 = vmin.f32 %v839_v10, %v818_v13  ;;  %v755_v39 = vrot.slane %v754_v18, 1  ;;  %v902_v48 = vsel %vm543_vm1, %v899_v26, -inf }
 0x1da   : > { %v861_v21 = vpop.permute.xlu0 %860  ;;  %v866_v22 = vpop.permute.xlu1 %865  ;;  %v769_v44 = vrot.slane %v768_v25, 1  ;;  %v916_v49 = vsel %vm543_vm1, %v899_v26, inf  ;;  %v692_v10 = vmin.f32 %v690_v33, %v691_v58  ;;  %v2250_v58 = vld [vmem:[%s3615_s2 + $0x300] sm:$0xff] }
 0x1db   : > { %1499 = vperm.xlu0 %2597, %v2234_v14   ;;  %v828_v29 = vmax.f32 %v826_v11, %v827_v19  ;;  %v842_v30 = vmin.f32 %v840_v12, %v841_v20  ;;  %v893_v45 = vmul.f32 %v861_v21, %v3049_v38  ;;  %v756_v63 = vmax.f32 %v754_v18, %v755_v39 }
 0x1dc   : > { %1562 = vperm.xlu1 %2598, %v2238_v16   ;;  %v894_v0 = vmul.f32 %v866_v22, %v3038_v35  ;;  %v770_v2 = vmin.f32 %v768_v25, %v769_v44  ;;  %v2245_v25 = vld [vmem:[%s3615_s2 + $0x2d8] sm:$0xff]  ;;  %v2247_v44 = vld [vmem:[%s3615_s2 + $0x2e8] sm:$0xff] }
 0x1dd   : > { %v829_v40 = vrot.slane %v828_v29, 4  ;;  %v843_v41 = vrot.slane %v842_v30, 4  ;;  %v757_v15 = vadd.f32 %v756_v63, %v678_v6  ;;  %v2258_v63 = vld [vmem:[%s3615_s2 + $0x340] sm:$0x1] }
 0x1de   : > { %v871_v42 = vpop.permute.xlu0 %870  ;;  %v881_v43 = vpop.permute.xlu1 %880  ;;  %v771_v20 = vadd.f32 %v770_v2, %v692_v10 }
 0x1df   : > { %v895_v46 = vmul.f32 %v871_v42, %v3031_v34  ;;  %v897_v47 = vmul.f32 %v881_v43, %v3012_v28  ;;  %1567 = vperm.xlu0 %2597, %v2239_v32   ;;  %v830_v50 = vmax.f32 %v828_v29, %v829_v40  ;;  %v844_v51 = vmin.f32 %v842_v30, %v843_v41  ;;  %v2246_v30 = vld [vmem:[%s3615_s2 + $0x2e0] sm:$0xff] }
 0x1e0   : > { %1572 = vperm.xlu1 %2598, %v2240_v36  }
 0x1e1   : > { %v903_v53 = vmax.f32 %v895_v46, %v902_v48  ;;  %v917_v54 = vmin.f32 %v895_v46, %v916_v49  ;;  %v900_v55 = vmax.f32 %v893_v45, %v897_v47  ;;  %v914_v56 = vmin.f32 %v893_v45, %v897_v47  ;;  %v2249_v49 = vld [vmem:[%s3615_s2 + $0x2f8] sm:$0xff] }
 0x1e2   : > { %v831_v59 = vrot.slane %v830_v50, 2  ;;  %v845_v60 = vrot.slane %v844_v51, 2  ;;  %v886_v61 = vpop.permute.xlu0 %885  ;;  %v969_v62 = vpop.permute.xlu1 %968 }
 0x1e3   : > { %v898_v1 = vmul.f32 %v886_v61, %v3007_v27  ;;  %1582 = vperm.xlu0 %2597, %v2242_v52   ;;  %v977_v22 = vmul.f32 %v969_v62, %v2995_v23 }
 0x1e4   : > { %v832_v3 = vmax.f32 %v830_v50, %v831_v59  ;;  %v846_v4 = vmin.f32 %v844_v51, %v845_v60  ;;  %1587 = vperm.xlu1 %2598, %v2243_v57  }
 0x1e5   : > { %v901_v7 = vmax.f32 %v894_v0, %v898_v1  ;;  %v915_v8 = vmin.f32 %v894_v0, %v898_v1  ;;  %v980_v42 = vsel %vm543_vm1, %v977_v22, -inf  ;;  %v994_v43 = vsel %vm543_vm1, %v977_v22, inf  ;;  %v2253_v22 = vld [vmem:[%s3615_s2 + $0x318] sm:$0xff] }
 0x1e6   : > { %v833_v11 = vrot.slane %v832_v3, 1  ;;  %v847_v12 = vrot.slane %v846_v4, 1  ;;  %v876_v13 = vpop.permute.xlu0 %875  ;;  %v939_v14 = vpop.permute.xlu1 %938 }
 0x1e7   : > { %v904_v16 = vmax.f32 %v900_v55, %v901_v7  ;;  %v918_v18 = vmin.f32 %v914_v56, %v915_v8  ;;  %v896_v19 = vmul.f32 %v876_v13, %v3021_v31  ;;  %1670 = vperm.xlu0 %2597, %v2251_v5   ;;  %v971_v50 = vmul.f32 %v939_v14, %v3049_v38 }
 0x1e8   : > { %v834_v21 = vmax.f32 %v832_v3, %v833_v11  ;;  %v848_v17 = vmin.f32 %v846_v4, %v847_v12  ;;  %1577 = vperm.xlu1 %2598, %v2241_v9   ;;  %v2248_v9 = vld [vmem:[%s3615_s2 + $0x2f0] sm:$0xff] }
 0x1e9   : > { %v905_v26 = vmax.f32 %v903_v53, %v896_v19  ;;  %v919_v29 = vmin.f32 %v917_v54, %v896_v19  ;;  %v2252_v12 = vld [vmem:[%s3615_s2 + $0x310] sm:$0xff] }
 0x1ea   : > { %v835_v32 = vadd.f32 %v834_v21, %v757_v15  ;;  %v849_v33 = vadd.f32 %v848_v17, %v771_v20  ;;  %v944_v36 = vpop.permute.xlu0 %943  ;;  %v949_v37 = vpop.permute.xlu1 %948 }
 0x1eb   : > { %v906_v39 = vmax.f32 %v904_v16, %v905_v26  ;;  %v920_v40 = vmin.f32 %v918_v18, %v919_v29  ;;  %v973_v41 = vmul.f32 %v949_v37, %v3031_v34  ;;  %1640 = vperm.xlu0 %2597, %v2245_v25   ;;  %v972_v57 = vmul.f32 %v944_v36, %v3038_v35  ;;  %v2254_v29 = vld [vmem:[%s3615_s2 + $0x320] sm:$0xff] }
 0x1ec   : > { %1645 = vperm.xlu1 %2598, %v2246_v30  }
 0x1ed   : > { %v907_v45 = vrot.slane %v906_v39, 4  ;;  %v921_v46 = vrot.slane %v920_v40, 4  ;;  %v981_v47 = vmax.f32 %v973_v41, %v980_v42  ;;  %v995_v48 = vmin.f32 %v973_v41, %v994_v43 }
 0x1ee   : > { %v959_v51 = vpop.permute.xlu0 %958  ;;  %v964_v52 = vpop.permute.xlu1 %963 }
 0x1ef   : > { %v908_v53 = vmax.f32 %v906_v39, %v907_v45  ;;  %v922_v54 = vmin.f32 %v920_v40, %v921_v46  ;;  %v975_v55 = vmul.f32 %v959_v51, %v3012_v28  ;;  %v976_v56 = vmul.f32 %v964_v52, %v3007_v27  ;;  %1650 = vperm.xlu0 %2597, %v2247_v44   ;;  %v2256_v45 = vld [vmem:[%s3615_s2 + $0x330] sm:$0xff] }
 0x1f0   : > { %1660 = vperm.xlu1 %2598, %v2249_v49  }
 0x1f1   : > { %v909_v59 = vrot.slane %v908_v53, 2  ;;  %v923_v60 = vrot.slane %v922_v54, 2  ;;  %v978_v61 = vmax.f32 %v971_v50, %v975_v55  ;;  %v992_v62 = vmin.f32 %v971_v50, %v975_v55  ;;  %v2257_v50 = vld [vmem:[%s3615_s2 + $0x338] sm:$0xff] }
 0x1f2   : > { %v979_v0 = vmax.f32 %v972_v57, %v976_v56  ;;  %v993_v1 = vmin.f32 %v972_v57, %v976_v56  ;;  %v1047_v2 = vpop.permute.xlu0 %1046  ;;  %v954_v3 = vpop.permute.xlu1 %953 }
 0x1f3   : > { %v910_v4 = vmax.f32 %v908_v53, %v909_v59  ;;  %v924_v5 = vmin.f32 %v922_v54, %v923_v60  ;;  %v974_v6 = vmul.f32 %v954_v3, %v3021_v31  ;;  %1665 = vperm.xlu0 %2597, %v2250_v58   ;;  %v1055_v20 = vmul.f32 %v1047_v2, %v2995_v23  ;;  %v2265_v59 = vld [vmem:[%s3615_s2 + $0x378] sm:$0x1] }
 0x1f4   : > { %v982_v7 = vmax.f32 %v978_v61, %v979_v0  ;;  %v996_v8 = vmin.f32 %v992_v62, %v993_v1  ;;  %1748 = vperm.xlu1 %2598, %v2258_v63   ;;  %v2255_v62 = vld [vmem:[%s3615_s2 + $0x328] sm:$0xff] }
 0x1f5   : > { %v911_v10 = vrot.slane %v910_v4, 1  ;;  %v925_v11 = vrot.slane %v924_v5, 1  ;;  %v983_v13 = vmax.f32 %v981_v47, %v974_v6  ;;  %v997_v14 = vmin.f32 %v995_v48, %v974_v6 }
 0x1f6   : > { %v1017_v15 = vpop.permute.xlu0 %1016  ;;  %v1022_v16 = vpop.permute.xlu1 %1021  ;;  %v1058_v43 = vsel %vm543_vm1, %v1055_v20, -inf }
 0x1f7   : > { %v912_v18 = vmax.f32 %v910_v4, %v911_v10  ;;  %v926_v19 = vmin.f32 %v924_v5, %v925_v11  ;;  %1655 = vperm.xlu0 %2597, %v2248_v9   ;;  %v984_v21 = vmax.f32 %v982_v7, %v983_v13  ;;  %v998_v17 = vmin.f32 %v996_v8, %v997_v14  ;;  %v2259_v9 = vld [vmem:[%s3615_s2 + $0x348] sm:$0xff] }
 0x1f8   : > { %1718 = vperm.xlu1 %2598, %v2252_v12   ;;  %v1049_v40 = vmul.f32 %v1017_v15, %v3049_v38  ;;  %v1050_v55 = vmul.f32 %v1022_v16, %v3038_v35  ;;  %v2260_v12 = vld [vmem:[%s3615_s2 + $0x350] sm:$0xff] }
 0x1f9   : > { %v913_v25 = vadd.f32 %v912_v18, %v835_v32  ;;  %v927_v26 = vadd.f32 %v926_v19, %v849_v33  ;;  %v985_v30 = vrot.slane %v984_v21, 4  ;;  %v999_v36 = vrot.slane %v998_v17, 4 }
 0x1fa   : > { %v1027_v37 = vpop.permute.xlu0 %1026  ;;  %v1037_v39 = vpop.permute.xlu1 %1036  ;;  %v1072_v32 = vsel %vm543_vm1, %v1055_v20, inf }
 0x1fb   : > { %v1051_v41 = vmul.f32 %v1027_v37, %v3031_v34  ;;  %v1053_v42 = vmul.f32 %v1037_v39, %v3012_v28  ;;  %1723 = vperm.xlu0 %2597, %v2253_v22   ;;  %v986_v33 = vmax.f32 %v984_v21, %v985_v30  ;;  %v1000_v44 = vmin.f32 %v998_v17, %v999_v36  ;;  %v2261_v22 = vld [vmem:[%s3615_s2 + $0x358] sm:$0xff]  ;;  %v2263_v36 = vld [vmem:[%s3615_s2 + $0x368] sm:$0xff] }
 0x1fc   : > { %1728 = vperm.xlu1 %2598, %v2254_v29  }
 0x1fd   : > { %v1059_v46 = vmax.f32 %v1051_v41, %v1058_v43  ;;  %v1073_v47 = vmin.f32 %v1051_v41, %v1072_v32  ;;  %v1056_v48 = vmax.f32 %v1049_v40, %v1053_v42  ;;  %v1070_v49 = vmin.f32 %v1049_v40, %v1053_v42  ;;  %v1883_v41 = vld [vmem:[%s3617_s4 + $0x78] sm:$0xff] }
 0x1fe   : > { %v987_v51 = vrot.slane %v986_v33, 2  ;;  %v1001_v52 = vrot.slane %v1000_v44, 2  ;;  %v1042_v53 = vpop.permute.xlu0 %1041  ;;  %v1125_v54 = vpop.permute.xlu1 %1124  ;;  %2431 = vmatpush3.msra.mxu1 %v1883_v41  ;;  %v3427_v41 = vld [vmem:[#allocation2 + $0x20] sm:$0xff] }
 0x1ff   : > { %v1054_v56 = vmul.f32 %v1042_v53, %v3007_v27  ;;  %1738 = vperm.xlu0 %2597, %v2256_v45   ;;  %v1133_v8 = vmul.f32 %v1125_v54, %v2995_v23  ;;  %v2264_v45 = vld [vmem:[%s3615_s2 + $0x370] sm:$0xff]  ;;  %2432 = vmatprep.subr.mxu1 %v2724_v24 }
 0x200   : > { %v988_v57 = vmax.f32 %v986_v33, %v987_v51  ;;  %v1002_v58 = vmin.f32 %v1000_v44, %v1001_v52  ;;  %1743 = vperm.xlu1 %2598, %v2257_v50  }
 0x201   : > { %v1057_v60 = vmax.f32 %v1050_v55, %v1054_v56  ;;  %v1071_v61 = vmin.f32 %v1050_v55, %v1054_v56  ;;  %v1136_v21 = vsel %vm543_vm1, %v1133_v8, -inf  ;;  %v1150_v17 = vsel %vm543_vm1, %v1133_v8, inf  ;;  %v1881_v55 = vld [vmem:[%s3617_s4 + $0x68] sm:$0xff] }
 0x202   : > { %v989_v63 = vrot.slane %v988_v57, 1  ;;  %v1003_v0 = vrot.slane %v1002_v58, 1  ;;  %v1032_v1 = vpop.permute.xlu0 %1031  ;;  %v1095_v2 = vpop.permute.xlu1 %1094 }
 0x203   : > { %v1060_v3 = vmax.f32 %v1056_v48, %v1057_v60  ;;  %v1074_v4 = vmin.f32 %v1070_v49, %v1071_v61  ;;  %v1052_v5 = vmul.f32 %v1032_v1, %v3021_v31  ;;  %1826 = vperm.xlu0 %2597, %v2265_v59   ;;  %v1127_v37 = vmul.f32 %v1095_v2, %v3049_v38  ;;  %v1880_v61 = vld [vmem:[%s3617_s4 + $0x60] sm:$0xff] }
 0x204   : > { %v990_v6 = vmax.f32 %v988_v57, %v989_v63  ;;  %v1004_v7 = vmin.f32 %v1002_v58, %v1003_v0  ;;  %1733 = vperm.xlu1 %2598, %v2255_v62  }
 0x205   : > { %v1061_v10 = vmax.f32 %v1059_v46, %v1052_v5  ;;  %v1075_v11 = vmin.f32 %v1073_v47, %v1052_v5  ;;  %v1882_v46 = vld [vmem:[%s3617_s4 + $0x70] sm:$0xff] }
 0x206   : > { %v3360_v13 = vadd.f32 %v990_v6, %v913_v25  ;;  %v3362_v14 = vadd.f32 %v1004_v7, %v927_v26  ;;  %v1100_v15 = vpop.permute.xlu0 %1099  ;;  %v1105_v16 = vpop.permute.xlu1 %1104  ;;  %2433 = vmatpush3.msra.mxu1 %v1882_v46 }
 0x207   : > { %v1062_v18 = vmax.f32 %v1060_v3, %v1061_v10  ;;  %v1076_v19 = vmin.f32 %v1074_v4, %v1075_v11  ;;  %v1129_v20 = vmul.f32 %v1105_v16, %v3031_v34  ;;  %1796 = vperm.xlu0 %2597, %v2259_v9   ;;  %v1128_v44 = vmul.f32 %v1100_v15, %v3038_v35  ;;  %v1878_v9 = vld [vmem:[%s3617_s4 + $0x50] sm:$0xff] }
 0x208   : > { %1801 = vperm.xlu1 %2598, %v2260_v12   ;;  %2434 = vmatprep.subr.mxu1 %v2724_v24 }
 0x209   : > { %v1063_v25 = vrot.slane %v1062_v18, 4  ;;  %v1077_v29 = vrot.slane %v1076_v19, 4  ;;  %v1137_v26 = vmax.f32 %v1129_v20, %v1136_v21  ;;  %v1151_v30 = vmin.f32 %v1129_v20, %v1150_v17  ;;  %2435 = vmatpush3.msra.mxu1 %v1881_v55  ;;  %v3441_v55 = vld [vmem:[#allocation2 + $0x28] sm:$0x1] }
 0x20a   : > { %v1115_v39 = vpop.permute.xlu0 %1114  ;;  %v1120_v40 = vpop.permute.xlu1 %1119  ;;  %2436 = vmatprep.subr.mxu1 %v2724_v24 }
 0x20b   : > { %v1064_v42 = vmax.f32 %v1062_v18, %v1063_v25  ;;  %v1078_v43 = vmin.f32 %v1076_v19, %v1077_v29  ;;  %v1131_v32 = vmul.f32 %v1115_v39, %v3012_v28  ;;  %v1132_v33 = vmul.f32 %v1120_v40, %v3007_v27  ;;  %1806 = vperm.xlu0 %2597, %v2261_v22   ;;  %v2262_v27 = vld [vmem:[%s3615_s2 + $0x360] sm:$0xff]  ;;  %v1875_v39 = vld [vmem:[%s3617_s4 + $0x38] sm:$0xff] }
 0x20c   : > { %1816 = vperm.xlu1 %2598, %v2263_v36   ;;  %2437 = vmatpush3.msra.mxu1 %v1880_v61  ;;  %v1876_v25 = vld [vmem:[%s3617_s4 + $0x40] sm:$0xff] }
 0x20d   : > { %v1065_v47 = vrot.slane %v1064_v42, 2  ;;  %v1079_v48 = vrot.slane %v1078_v43, 2  ;;  %v1134_v49 = vmax.f32 %v1127_v37, %v1131_v32  ;;  %v1148_v50 = vmin.f32 %v1127_v37, %v1131_v32  ;;  %2438 = vmatprep.subr.mxu1 %v2724_v24 }
 0x20e   : > { %v1135_v51 = vmax.f32 %v1128_v44, %v1132_v33  ;;  %v1149_v52 = vmin.f32 %v1128_v44, %v1132_v33  ;;  %v1203_v53 = vpop.permute.xlu0 %1202  ;;  %v1110_v54 = vpop.permute.xlu1 %1109  ;;  %v1874_v33 = vld [vmem:[%s3617_s4 + $0x30] sm:$0xff] }
 0x20f   : > { %v1066_v56 = vmax.f32 %v1064_v42, %v1065_v47  ;;  %v1080_v57 = vmin.f32 %v1078_v43, %v1079_v48  ;;  %v1130_v58 = vmul.f32 %v1110_v54, %v3021_v31  ;;  %1821 = vperm.xlu0 %2597, %v2264_v45   ;;  %v1879_v31 = vld [vmem:[%s3617_s4 + $0x58] sm:$0xff]  ;;  %v1211_v6 = vmul.f32 %v1203_v53, %v2995_v23  ;;  %v1877_v23 = vld [vmem:[%s3617_s4 + $0x48] sm:$0xff] }
 0x210   : > { %v1138_v59 = vmax.f32 %v1134_v49, %v1135_v51  ;;  %v1152_v60 = vmin.f32 %v1148_v50, %v1149_v52  ;;  %1811 = vperm.xlu1 %2598, %v2262_v27   ;;  %2439 = vmatpush3.msra.mxu1 %v1879_v31  ;;  %v1873_v49 = vld [vmem:[%s3617_s4 + $0x28] sm:$0xff]  ;;  %v3438_v51 = vld [vmem:[#allocation2 + $0x10] sm:$0xff] }
 0x211   : > { %v1067_v62 = vrot.slane %v1066_v56, 1  ;;  %v1081_v63 = vrot.slane %v1080_v57, 1  ;;  %v1139_v0 = vmax.f32 %v1137_v26, %v1130_v58  ;;  %v1153_v1 = vmin.f32 %v1151_v30, %v1130_v58  ;;  %2440 = vmatprep.subr.mxu1 %v2724_v24 }
 0x212   : > { %v1173_v2 = vpop.permute.xlu0 %1172  ;;  %v1178_v3 = vpop.permute.xlu1 %1177  ;;  %2441 = vmatpush3.msra.mxu1 %v1878_v9 }
 0x213   : > { %v1068_v4 = vmax.f32 %v1066_v56, %v1067_v62  ;;  %v1082_v5 = vmin.f32 %v1080_v57, %v1081_v63  ;;  %v1140_v7 = vmax.f32 %v1138_v59, %v1139_v0  ;;  %v1154_v8 = vmin.f32 %v1152_v60, %v1153_v1  ;;  %2442 = vmatprep.subr.mxu1 %v2724_v24  ;;  %v1872_v57 = vld [vmem:[%s3617_s4 + $0x20] sm:$0xff]  ;;  %v1871_v0 = vld [vmem:[%s3617_s4 + $0x18] sm:$0xff] }
 0x214   : > { %v1205_v19 = vmul.f32 %v1173_v2, %v3049_v38  ;;  %2443 = vmatpush3.msra.mxu1 %v1877_v23  ;;  %v1206_v40 = vmul.f32 %v1178_v3, %v3038_v35  ;;  %v3456_v3 = vld [vmem:[#allocation2 + $0x18] sm:$0xff]  ;;  %v1869_v23 = vld [vmem:[%s3617_s4 + $0x8] sm:$0xff] }
 0x215   : > { %v1069_v10 = vadd.f32 %v1068_v4, %v3360_v13  ;;  %v1083_v11 = vadd.f32 %v1082_v5, %v3362_v14  ;;  %v1141_v12 = vrot.slane %v1140_v7, 4  ;;  %v1155_v15 = vrot.slane %v1154_v8, 4  ;;  %2444 = vmatprep.subr.mxu1 %v2724_v24 }
 0x216   : > { %v1183_v16 = vpop.permute.xlu0 %1182  ;;  %v1193_v18 = vpop.permute.xlu1 %1192  ;;  %v1214_v13 = vsel %vm543_vm1, %v1211_v6, -inf  ;;  %v1228_v14 = vsel %vm543_vm1, %v1211_v6, inf  ;;  %2445 = vmatpush3.msra.mxu1 %v1876_v25 }
 0x217   : > { %v1207_v20 = vmul.f32 %v1183_v16, %v3031_v34  ;;  %v1209_v21 = vmul.f32 %v1193_v18, %v3012_v28  ;;  %v1142_v17 = vmax.f32 %v1140_v7, %v1141_v12  ;;  %v1156_v22 = vmin.f32 %v1154_v8, %v1155_v15  ;;  %2446 = vmatprep.subr.mxu1 %v2724_v24  ;;  %v613_v6 = vpop.f32.mrf.mxu0  ;;  %v1870_v7 = vld [vmem:[%s3617_s4 + $0x10] sm:$0xff] }
 0x218   : > { %2447 = vmatpush3.msra.mxu1 %v1875_v39  ;;  %1864 = vst [vmem:[#allocation3] sm:$0x1] %v613_v6  ;;  %v3465_v12 = vld [vmem:[#allocation2 + $0x30] sm:$0xff] }
 0x219   : > { %v1215_v29 = vmax.f32 %v1207_v20, %v1214_v13  ;;  %v1229_v26 = vmin.f32 %v1207_v20, %v1228_v14  ;;  %v1212_v38 = vmax.f32 %v1205_v19, %v1209_v21  ;;  %v1226_v30 = vmin.f32 %v1205_v19, %v1209_v21  ;;  %2448 = vmatprep.subr.mxu1 %v2724_v24  ;;  %v3472_v21 = vld [vmem:[#allocation2 + $0x8] sm:$0xff] }
 0x21a   : > { %v1143_v34 = vrot.slane %v1142_v17, 2  ;;  %v1157_v28 = vrot.slane %v1156_v22, 2  ;;  %v1198_v36 = vpop.permute.xlu0 %1197  ;;  %v1281_v37 = vpop.permute.xlu1 %1280  ;;  %2449 = vmatpush3.msra.mxu1 %v1874_v33 }
 0x21b   : > { %v1210_v42 = vmul.f32 %v3427_v41, %v1198_v36  ;;  %v1289_v56 = vmul.f32 %v3441_v55, %v1281_v37  ;;  %2450 = vmatprep.subr.mxu1 %v2724_v24 }
 0x21c   : > { %v1144_v43 = vmax.f32 %v1142_v17, %v1143_v34  ;;  %v1158_v32 = vmin.f32 %v1156_v22, %v1157_v28  ;;  %2451 = vmatpush3.msra.mxu1 %v1873_v49  ;;  %v2429_v17 = vpop.f32.mrf.mxu0  ;;  %v3476_v22 = vld [vmem:[#allocation2] sm:$0xff] }
 0x21d   : > { %v1213_v44 = vmax.f32 %v1206_v40, %v1210_v42  ;;  %v1227_v45 = vmin.f32 %v1206_v40, %v1210_v42  ;;  %2452 = vmatprep.subr.mxu1 %v2724_v24  ;;  %v1292_v4 = vsel %vm543_vm1, %v1289_v56, -inf  ;;  %v1306_v5 = vsel %vm543_vm1, %v1289_v56, inf  ;;  %v1955_v28 = vld [vmem:[%s3618_s5] sm:$0xff] }
 0x21e   : > { %v1145_v46 = vrot.slane %v1144_v43, 1  ;;  %v1159_v47 = vrot.slane %v1158_v32, 1  ;;  %v1188_v48 = vpop.permute.xlu0 %1187  ;;  %v1251_v35 = vpop.permute.xlu1 %1250  ;;  %2453 = vmatpush3.msra.mxu1 %v1872_v57  ;;  %2466 = vmatpush3.msra.mxu0 %v1955_v28 }
 0x21f   : > { %v1216_v50 = vmax.f32 %v1212_v38, %v1213_v44  ;;  %v1230_v27 = vmin.f32 %v1226_v30, %v1227_v45  ;;  %v1208_v52 = vmul.f32 %v3438_v51, %v1188_v48  ;;  %2454 = vmatprep.subr.mxu1 %v2724_v24  ;;  %v1283_v15 = vmul.f32 %v3465_v12, %v1251_v35 }
 0x220   : > { %v1146_v53 = vmax.f32 %v1144_v43, %v1145_v46  ;;  %v1160_v54 = vmin.f32 %v1158_v32, %v1159_v47  ;;  %2455 = vmatpush3.msra.mxu1 %v1871_v0 }
 0x221   : > { %v1217_v58 = vmax.f32 %v1215_v29, %v1208_v52  ;;  %v1231_v59 = vmin.f32 %v1229_v26, %v1208_v52  ;;  %2456 = vmatprep.subr.mxu1 %v2724_v24  ;;  %v1868_v29 = vld [vmem:[%s3617_s4] sm:$0xff] }
 0x222   : > { %v3448_v60 = vadd.f32 %v1146_v53, %v1069_v10  ;;  %v3450_v61 = vadd.f32 %v1160_v54, %v1083_v11  ;;  %v1256_v62 = vpop.permute.xlu0 %1255  ;;  %v1261_v63 = vpop.permute.xlu1 %1260  ;;  %2457 = vmatpush3.msra.mxu1 %v1870_v7 }
 0x223   : > { %v1218_v1 = vmax.f32 %v1216_v50, %v1217_v58  ;;  %v1232_v2 = vmin.f32 %v1230_v27, %v1231_v59  ;;  %v1285_v31 = vmul.f32 %v3456_v3, %v1261_v63  ;;  %v1284_v25 = vmul.f32 %v3476_v22, %v1256_v62  ;;  %2458 = vmatprep.subr.mxu1 %v2724_v24 }
 0x224   : > { %2459 = vmatpush3.msra.mxu1 %v1869_v23 }
 0x225   : > { %v1219_v8 = vrot.slane %v1218_v1, 4  ;;  %v1233_v9 = vrot.slane %v1232_v2, 4  ;;  %v1293_v10 = vmax.f32 %v1285_v31, %v1292_v4  ;;  %v1307_v11 = vmin.f32 %v1285_v31, %v1306_v5  ;;  %2460 = vmatprep.subr.mxu1 %v2724_v24 }
 0x226   : > { %v1271_v16 = vpop.permute.xlu0 %1270  ;;  %v1276_v18 = vpop.permute.xlu1 %1275  ;;  %2461 = vmatpush3.msra.mxu1 %v1868_v29 }
 0x227   : > { %v1220_v19 = vmax.f32 %v1218_v1, %v1219_v8  ;;  %v1234_v20 = vmin.f32 %v1232_v2, %v1233_v9  ;;  %v1287_v13 = vmul.f32 %v3472_v21, %v1271_v16  ;;  %v1288_v14 = vmul.f32 %v3427_v41, %v1276_v18 }
 0x229   : > { %v1221_v26 = vrot.slane %v1220_v19, 2  ;;  %v1235_v38 = vrot.slane %v1234_v20, 2  ;;  %v1290_v30 = vmax.f32 %v1283_v15, %v1287_v13  ;;  %v1304_v34 = vmin.f32 %v1283_v15, %v1287_v13 }
 0x22a   : > { %v1291_v36 = vmax.f32 %v1284_v25, %v1288_v14  ;;  %v1305_v37 = vmin.f32 %v1284_v25, %v1288_v14  ;;  %v1359_v39 = vpop.permute.xlu0 %1358  ;;  %v1266_v40 = vpop.permute.xlu1 %1265 }
 0x22b   : > { %v1222_v42 = vmax.f32 %v1220_v19, %v1221_v26  ;;  %v1236_v43 = vmin.f32 %v1234_v20, %v1235_v38  ;;  %v1286_v32 = vmul.f32 %v3438_v51, %v1266_v40  ;;  %v1367_v52 = vmul.f32 %v3441_v55, %v1359_v39 }
 0x22c   : > { %v1294_v33 = vmax.f32 %v1290_v30, %v1291_v36  ;;  %v1308_v44 = vmin.f32 %v1304_v34, %v1305_v37 }
 0x22d   : > { %v1223_v45 = vrot.slane %v1222_v42, 1  ;;  %v1237_v46 = vrot.slane %v1236_v43, 1  ;;  %v1295_v47 = vmax.f32 %v1293_v10, %v1286_v32  ;;  %v1309_v48 = vmin.f32 %v1307_v11, %v1286_v32 }
 0x22e   : > { %v1329_v35 = vpop.permute.xlu0 %1328  ;;  %v1334_v49 = vpop.permute.xlu1 %1333  ;;  %v1370_v2 = vsel %vm543_vm1, %v1367_v52, -inf  ;;  %v1384_v31 = vsel %vm543_vm1, %v1367_v52, inf }
 0x22f   : > { %v1224_v50 = vmax.f32 %v1222_v42, %v1223_v45  ;;  %v1238_v27 = vmin.f32 %v1236_v43, %v1237_v46  ;;  %v1296_v53 = vmax.f32 %v1294_v33, %v1295_v47  ;;  %v1310_v24 = vmin.f32 %v1308_v44, %v1309_v48 }
 0x230   : > { %v1361_v63 = vmul.f32 %v3465_v12, %v1329_v35  ;;  %v1362_v15 = vmul.f32 %v3476_v22, %v1334_v49 }
 0x231   : > { %v1225_v54 = vadd.f32 %v1224_v50, %v3448_v60  ;;  %v1239_v56 = vadd.f32 %v1238_v27, %v3450_v61  ;;  %v1297_v57 = vrot.slane %v1296_v53, 4  ;;  %v1311_v58 = vrot.slane %v1310_v24, 4 }
 0x232   : > { %v1339_v59 = vpop.permute.xlu0 %1338  ;;  %v1349_v62 = vpop.permute.xlu1 %1348 }
 0x233   : > { %v1363_v0 = vmul.f32 %v3456_v3, %v1339_v59  ;;  %v1365_v1 = vmul.f32 %v3472_v21, %v1349_v62  ;;  %v1298_v4 = vmax.f32 %v1296_v53, %v1297_v57  ;;  %v1312_v5 = vmin.f32 %v1310_v24, %v1311_v58 }
 0x235   : > { %v1371_v6 = vmax.f32 %v1363_v0, %v1370_v2  ;;  %v1385_v60 = vmin.f32 %v1363_v0, %v1384_v31  ;;  %v1368_v7 = vmax.f32 %v1361_v63, %v1365_v1  ;;  %v1382_v61 = vmin.f32 %v1361_v63, %v1365_v1 }
 0x236   : > { %v1299_v8 = vrot.slane %v1298_v4, 2  ;;  %v1313_v9 = vrot.slane %v1312_v5, 2  ;;  %v1354_v10 = vpop.permute.xlu0 %1353  ;;  %v1437_v11 = vpop.permute.xlu1 %1436 }
 0x237   : > { %v1366_v16 = vmul.f32 %v3427_v41, %v1354_v10  ;;  %v1445_v28 = vmul.f32 %v3441_v55, %v1437_v11 }
 0x238   : > { %v1300_v18 = vmax.f32 %v1298_v4, %v1299_v8  ;;  %v1314_v23 = vmin.f32 %v1312_v5, %v1313_v9 }
 0x239   : > { %v1369_v19 = vmax.f32 %v1362_v15, %v1366_v16  ;;  %v1383_v20 = vmin.f32 %v1362_v15, %v1366_v16  ;;  %v1448_v45 = vsel %vm543_vm1, %v1445_v28, -inf  ;;  %v1462_v46 = vsel %vm543_vm1, %v1445_v28, inf }
 0x23a   : > { %v1301_v13 = vrot.slane %v1300_v18, 1  ;;  %v1315_v14 = vrot.slane %v1314_v23, 1  ;;  %v1344_v17 = vpop.permute.xlu0 %1343  ;;  %v1407_v38 = vpop.permute.xlu1 %1406 }
 0x23b   : > { %v1372_v25 = vmax.f32 %v1368_v7, %v1369_v19  ;;  %v1386_v29 = vmin.f32 %v1382_v61, %v1383_v20  ;;  %v1364_v26 = vmul.f32 %v3438_v51, %v1344_v17  ;;  %v1439_v53 = vmul.f32 %v3465_v12, %v1407_v38 }
 0x23c   : > { %v1302_v30 = vmax.f32 %v1300_v18, %v1301_v13  ;;  %v1316_v34 = vmin.f32 %v1314_v23, %v1315_v14 }
 0x23d   : > { %v1373_v36 = vmax.f32 %v1371_v6, %v1364_v26  ;;  %v1387_v37 = vmin.f32 %v1385_v60, %v1364_v26 }
 0x23e   : > { %v1303_v39 = vadd.f32 %v1302_v30, %v1225_v54  ;;  %v1317_v40 = vadd.f32 %v1316_v34, %v1239_v56  ;;  %v1412_v42 = vpop.permute.xlu0 %1411  ;;  %v1417_v33 = vpop.permute.xlu1 %1416 }
 0x23f   : > { %v1374_v43 = vmax.f32 %v1372_v25, %v1373_v36  ;;  %v1388_v32 = vmin.f32 %v1386_v29, %v1387_v37  ;;  %v1441_v44 = vmul.f32 %v3456_v3, %v1417_v33  ;;  %v1440_v56 = vmul.f32 %v3476_v22, %v1412_v42 }
 0x241   : > { %v1375_v47 = vrot.slane %v1374_v43, 4  ;;  %v1389_v48 = vrot.slane %v1388_v32, 4  ;;  %v1449_v35 = vmax.f32 %v1441_v44, %v1448_v45  ;;  %v1463_v49 = vmin.f32 %v1441_v44, %v1462_v46 }
 0x242   : > { %v1427_v50 = vpop.permute.xlu0 %1426  ;;  %v1432_v54 = vpop.permute.xlu1 %1431 }
 0x243   : > { %v1376_v27 = vmax.f32 %v1374_v43, %v1375_v47  ;;  %v1390_v52 = vmin.f32 %v1388_v32, %v1389_v48  ;;  %v1443_v24 = vmul.f32 %v3472_v21, %v1427_v50  ;;  %v1444_v57 = vmul.f32 %v3427_v41, %v1432_v54 }
 0x245   : > { %v1377_v58 = vrot.slane %v1376_v27, 2  ;;  %v1391_v59 = vrot.slane %v1390_v52, 2  ;;  %v1446_v62 = vmax.f32 %v1439_v53, %v1443_v24  ;;  %v1460_v63 = vmin.f32 %v1439_v53, %v1443_v24 }
 0x246   : > { %v1447_v0 = vmax.f32 %v1440_v56, %v1444_v57  ;;  %v1461_v1 = vmin.f32 %v1440_v56, %v1444_v57  ;;  %v1515_v2 = vpop.permute.xlu0 %1514  ;;  %v1422_v5 = vpop.permute.xlu1 %1421 }
 0x247   : > { %v1378_v31 = vmax.f32 %v1376_v27, %v1377_v58  ;;  %v1392_v4 = vmin.f32 %v1390_v52, %v1391_v59  ;;  %v1442_v7 = vmul.f32 %v3438_v51, %v1422_v5  ;;  %v1523_v53 = vmul.f32 %v3441_v55, %v1515_v2 }
 0x248   : > { %v1450_v6 = vmax.f32 %v1446_v62, %v1447_v0  ;;  %v1464_v60 = vmin.f32 %v1460_v63, %v1461_v1 }
 0x249   : > { %v1379_v61 = vrot.slane %v1378_v31, 1  ;;  %v1393_v8 = vrot.slane %v1392_v4, 1  ;;  %v1451_v9 = vmax.f32 %v1449_v35, %v1442_v7  ;;  %v1465_v10 = vmin.f32 %v1463_v49, %v1442_v7 }
 0x24a   : > { %v1485_v11 = vpop.permute.xlu0 %1484  ;;  %v1490_v18 = vpop.permute.xlu1 %1489  ;;  %v1526_v62 = vsel %vm543_vm1, %v1523_v53, -inf  ;;  %v1540_v1 = vsel %vm543_vm1, %v1523_v53, inf }
 0x24b   : > { %v1380_v15 = vmax.f32 %v1378_v31, %v1379_v61  ;;  %v1394_v16 = vmin.f32 %v1392_v4, %v1393_v8  ;;  %v1452_v23 = vmax.f32 %v1450_v6, %v1451_v9  ;;  %v1466_v19 = vmin.f32 %v1464_v60, %v1465_v10 }
 0x24c   : > { %v1518_v56 = vmul.f32 %v3476_v22, %v1490_v18  ;;  %v1517_v31 = vmul.f32 %v3465_v12, %v1485_v11 }
 0x24d   : > { %v1381_v20 = vadd.f32 %v1380_v15, %v1303_v39  ;;  %v1395_v13 = vadd.f32 %v1394_v16, %v1317_v40  ;;  %v1453_v14 = vrot.slane %v1452_v23, 4  ;;  %v1467_v17 = vrot.slane %v1466_v19, 4 }
 0x24e   : > { %v1495_v25 = vpop.permute.xlu0 %1494 }
 0x24f   : > { %v1505_v29 = vpop.permute.xlu1 %1504  ;;  %v1454_v26 = vmax.f32 %v1452_v23, %v1453_v14  ;;  %v1468_v38 = vmin.f32 %v1466_v19, %v1467_v17  ;;  %v1519_v57 = vmul.f32 %v3456_v3, %v1495_v25 }
 0x250   : > { %v1521_v58 = vmul.f32 %v3472_v21, %v1505_v29 }
 0x251   : > { %v1455_v30 = vrot.slane %v1454_v26, 2  ;;  %v1469_v34 = vrot.slane %v1468_v38, 2  ;;  %v1527_v61 = vmax.f32 %v1519_v57, %v1526_v62  ;;  %v1541_v8 = vmin.f32 %v1519_v57, %v1540_v1 }
 0x252   : > { %v1510_v28 = vpop.permute.xlu0 %1509  ;;  %v1524_v9 = vmax.f32 %v1517_v31, %v1521_v58  ;;  %v1538_v10 = vmin.f32 %v1517_v31, %v1521_v58 }
 0x253   : > { %v1593_v36 = vpop.permute.xlu1 %1592  ;;  %v1456_v37 = vmax.f32 %v1454_v26, %v1455_v30  ;;  %v1470_v42 = vmin.f32 %v1468_v38, %v1469_v34  ;;  %v1522_v54 = vmul.f32 %v3427_v41, %v1510_v28 }
 0x254   : > { %v1601_v63 = vmul.f32 %v3441_v55, %v1593_v36 }
 0x255   : > { %v1457_v43 = vrot.slane %v1456_v37, 1  ;;  %v1471_v32 = vrot.slane %v1470_v42, 1  ;;  %v1525_v2 = vmax.f32 %v1518_v56, %v1522_v54  ;;  %v1539_v5 = vmin.f32 %v1518_v56, %v1522_v54 }
 0x256   : > { %v1500_v33 = vpop.permute.xlu0 %1499  ;;  %v1604_v16 = vsel %vm543_vm1, %v1601_v63, -inf  ;;  %v1618_v18 = vsel %vm543_vm1, %v1601_v63, inf }
 0x257   : > { %v1563_v44 = vpop.permute.xlu1 %1562  ;;  %v1458_v45 = vmax.f32 %v1456_v37, %v1457_v43  ;;  %v1472_v46 = vmin.f32 %v1470_v42, %v1471_v32  ;;  %v1520_v4 = vmul.f32 %v3438_v51, %v1500_v33  ;;  %v1542_v25 = vmin.f32 %v1538_v10, %v1539_v5 }
 0x258   : > { %v1595_v11 = vmul.f32 %v3465_v12, %v1563_v44 }
 0x259   : > { %v3508_v39 = vadd.f32 %v1458_v45, %v1381_v20  ;;  %v3510_v40 = vadd.f32 %v1472_v46, %v1395_v13  ;;  %v1528_v20 = vmax.f32 %v1524_v9, %v1525_v2  ;;  %v1529_v13 = vmax.f32 %v1527_v61, %v1520_v4 }
 0x25a   : > { %v1568_v47 = vpop.permute.xlu0 %1567  ;;  %v1543_v14 = vmin.f32 %v1541_v8, %v1520_v4 }
 0x25b   : > { %v1573_v48 = vpop.permute.xlu1 %1572  ;;  %v1596_v23 = vmul.f32 %v3476_v22, %v1568_v47  ;;  %v1530_v33 = vmax.f32 %v1528_v20, %v1529_v13 }
 0x25c   : > { %v1597_v6 = vmul.f32 %v3456_v3, %v1573_v48  ;;  %v1544_v44 = vmin.f32 %v1542_v25, %v1543_v14 }
 0x25d   : > { %v1531_v5 = vrot.slane %v1530_v33, 4 }
 0x25e   : > { %v1583_v35 = vpop.permute.xlu0 %1582  ;;  %v1605_v29 = vmax.f32 %v1597_v6, %v1604_v16  ;;  %v1619_v30 = vmin.f32 %v1597_v6, %v1618_v18  ;;  %v1545_v6 = vrot.slane %v1544_v44, 4 }
 0x25f   : > { %v1588_v49 = vpop.permute.xlu1 %1587  ;;  %v1599_v60 = vmul.f32 %v3472_v21, %v1583_v35 }
 0x260   : > { %v1600_v7 = vmul.f32 %v3427_v41, %v1588_v49 }
 0x261   : > { %v1602_v26 = vmax.f32 %v1595_v11, %v1599_v60  ;;  %v1616_v34 = vmin.f32 %v1595_v11, %v1599_v60 }
 0x262   : > { %v1671_v50 = vpop.permute.xlu0 %1670  ;;  %v1603_v38 = vmax.f32 %v1596_v23, %v1600_v7  ;;  %v1617_v28 = vmin.f32 %v1596_v23, %v1600_v7 }
 0x263   : > { %v1578_v27 = vpop.permute.xlu1 %1577  ;;  %v1679_v36 = vmul.f32 %v3441_v55, %v1671_v50 }
 0x264   : > { %v1598_v17 = vmul.f32 %v3438_v51, %v1578_v27  ;;  %v1606_v47 = vmax.f32 %v1602_v26, %v1603_v38  ;;  %v1620_v27 = vmin.f32 %v1616_v34, %v1617_v28  ;;  %v1532_v26 = vmax.f32 %v1530_v33, %v1531_v5 }
 0x265   : > { %v1682_v50 = vsel %vm543_vm1, %v1679_v36, -inf  ;;  %v1696_v53 = vsel %vm543_vm1, %v1679_v36, inf  ;;  %v1546_v28 = vmin.f32 %v1544_v44, %v1545_v6 }
 0x266   : > { %v1641_v52 = vpop.permute.xlu0 %1640  ;;  %v1607_v45 = vmax.f32 %v1605_v29, %v1598_v17  ;;  %v1621_v46 = vmin.f32 %v1619_v30, %v1598_v17 }
 0x267   : > { %v1646_v24 = vpop.permute.xlu1 %1645  ;;  %v1673_v54 = vmul.f32 %v3465_v12, %v1641_v52 }
 0x268   : > { %v1674_v48 = vmul.f32 %v3476_v22, %v1646_v24  ;;  %v1608_v1 = vmax.f32 %v1606_v47, %v1607_v45  ;;  %v1622_v31 = vmin.f32 %v1620_v27, %v1621_v46 }
 0x26a   : > { %v1651_v59 = vpop.permute.xlu0 %1650  ;;  %v1609_v11 = vrot.slane %v1608_v1, 4  ;;  %v1623_v23 = vrot.slane %v1622_v31, 4 }
 0x26b   : > { %v1661_v0 = vpop.permute.xlu1 %1660  ;;  %v1675_v42 = vmul.f32 %v3456_v3, %v1651_v59 }
 0x26c   : > { %v1677_v35 = vmul.f32 %v3472_v21, %v1661_v0 }
 0x26d   : > { %v1683_v57 = vmax.f32 %v1675_v42, %v1682_v50  ;;  %v1697_v58 = vmin.f32 %v1675_v42, %v1696_v53  ;;  %v1533_v50 = vrot.slane %v1532_v26, 2 }
 0x26e   : > { %v1666_v15 = vpop.permute.xlu0 %1665  ;;  %v1680_v24 = vmax.f32 %v1673_v54, %v1677_v35  ;;  %v1694_v2 = vmin.f32 %v1673_v54, %v1677_v35 }
 0x26f   : > { %v1749_v19 = vpop.permute.xlu1 %1748  ;;  %v1678_v43 = vmul.f32 %v3427_v41, %v1666_v15 }
 0x270   : > { %v1757_v8 = vmul.f32 %v3441_v55, %v1749_v19 }
 0x271   : > { %v1681_v59 = vmax.f32 %v1674_v48, %v1678_v43  ;;  %v1695_v62 = vmin.f32 %v1674_v48, %v1678_v43  ;;  %v1610_v43 = vmax.f32 %v1608_v1, %v1609_v11 }
 0x272   : > { %v1656_v37 = vpop.permute.xlu0 %1655  ;;  %v1760_v38 = vsel %vm543_vm1, %v1757_v8, -inf  ;;  %v1774_v30 = vsel %vm543_vm1, %v1757_v8, inf }
 0x273   : > { %v1719_v32 = vpop.permute.xlu1 %1718  ;;  %v1676_v49 = vmul.f32 %v3438_v51, %v1656_v37  ;;  %v1684_v7 = vmax.f32 %v1680_v24, %v1681_v59  ;;  %v1698_v61 = vmin.f32 %v1694_v2, %v1695_v62 }
 0x274   : > { %v1751_v10 = vmul.f32 %v3465_v12, %v1719_v32  ;;  %v1624_v32 = vmin.f32 %v1622_v31, %v1623_v23 }
 0x275   : > { %v1685_v0 = vmax.f32 %v1683_v57, %v1676_v49  ;;  %v1699_v4 = vmin.f32 %v1697_v58, %v1676_v49  ;;  %v1611_v57 = vrot.slane %v1610_v43, 2 }
 0x276   : > { %v1724_v56 = vpop.permute.xlu0 %1723  ;;  %v1625_v44 = vrot.slane %v1624_v32, 2 }
 0x277   : > { %v1729_v63 = vpop.permute.xlu1 %1728  ;;  %v1752_v15 = vmul.f32 %v3476_v22, %v1724_v56  ;;  %v1686_v20 = vmax.f32 %v1684_v7, %v1685_v0  ;;  %v1700_v13 = vmin.f32 %v1698_v61, %v1699_v4  ;;  %v1547_v56 = vrot.slane %v1546_v28, 2 }
 0x278   : > { %v1753_v16 = vmul.f32 %v3456_v3, %v1729_v63  ;;  %v1534_v0 = vmax.f32 %v1532_v26, %v1533_v50  ;;  %v1626_v7 = vmin.f32 %v1624_v32, %v1625_v44 }
 0x279   : > { %v1687_v45 = vrot.slane %v1686_v20, 4  ;;  %v1701_v46 = vrot.slane %v1700_v13, 4  ;;  %v1548_v6 = vmin.f32 %v1546_v28, %v1547_v56 }
 0x27a   : > { %v1739_v60 = vpop.permute.xlu0 %1738  ;;  %v1761_v36 = vmax.f32 %v1753_v16, %v1760_v38  ;;  %v1775_v37 = vmin.f32 %v1753_v16, %v1774_v30 }
 0x27b   : > { %v1755_v52 = vmul.f32 %v3472_v21, %v1739_v60  ;;  %v1744_v9 = vpop.permute.xlu1 %1743  ;;  %v1688_v58 = vmax.f32 %v1686_v20, %v1687_v45  ;;  %v1702_v59 = vmin.f32 %v1700_v13, %v1701_v46  ;;  %v1612_v60 = vmax.f32 %v1610_v43, %v1611_v57 }
 0x27c   : > { %v1756_v18 = vmul.f32 %v3427_v41, %v1744_v9  ;;  %v1549_v26 = vrot.slane %v1548_v6, 1 }
 0x27d   : > { %v1758_v14 = vmax.f32 %v1751_v10, %v1755_v52  ;;  %v1772_v17 = vmin.f32 %v1751_v10, %v1755_v52  ;;  %v1689_v8 = vrot.slane %v1688_v58, 2  ;;  %v1703_v52 = vrot.slane %v1702_v59, 2 }
 0x27e   : > { %v1759_v25 = vmax.f32 %v1752_v15, %v1756_v18  ;;  %v1773_v29 = vmin.f32 %v1752_v15, %v1756_v18  ;;  %v1827_v19 = vpop.permute.xlu0 %1826 }
 0x27f   : > { %v1734_v34 = vpop.permute.xlu1 %1733  ;;  %v1835_v62 = vmul.f32 %v3441_v55, %v1827_v19  ;;  %v1535_v19 = vrot.slane %v1534_v0, 1  ;;  %v1690_v38 = vmax.f32 %v1688_v58, %v1689_v8  ;;  %v1704_v30 = vmin.f32 %v1702_v59, %v1703_v52 }
 0x280   : > { %v1754_v42 = vmul.f32 %v3438_v51, %v1734_v34  ;;  %v1762_v47 = vmax.f32 %v1758_v14, %v1759_v25  ;;  %v1776_v48 = vmin.f32 %v1772_v17, %v1773_v29 }
 0x281   : > { %v1838_v9 = vsel %vm543_vm1, %v1835_v62, -inf  ;;  %v1852_v55 = vsel %vm543_vm1, %v1835_v62, inf  ;;  %v1536_v45 = vmax.f32 %v1534_v0, %v1535_v19  ;;  %v1691_v46 = vrot.slane %v1690_v38, 1 }
 0x282   : > { %v1763_v35 = vmax.f32 %v1761_v36, %v1754_v42  ;;  %v1777_v49 = vmin.f32 %v1775_v37, %v1754_v42  ;;  %v1797_v27 = vpop.permute.xlu0 %1796  ;;  %v1613_v36 = vrot.slane %v1612_v60, 1 }
 0x283   : > { %v1802_v33 = vpop.permute.xlu1 %1801  ;;  %v1829_v15 = vmul.f32 %v3465_v12, %v1797_v27  ;;  %v1537_v56 = vadd.f32 %v1536_v45, %v3508_v39  ;;  %v1692_v44 = vmax.f32 %v1690_v38, %v1691_v46 }
 0x284   : > { %v1764_v53 = vmax.f32 %v1762_v47, %v1763_v35  ;;  %v1778_v54 = vmin.f32 %v1776_v48, %v1777_v49  ;;  %v1705_v47 = vrot.slane %v1704_v30, 1  ;;  %v1614_v49 = vmax.f32 %v1612_v60, %v1613_v36 }
 0x286   : > { %v1765_v63 = vrot.slane %v1764_v53, 4  ;;  %v1779_v1 = vrot.slane %v1778_v54, 4  ;;  %v1807_v31 = vpop.permute.xlu0 %1806  ;;  %v1706_v58 = vmin.f32 %v1704_v30, %v1705_v47 }
 0x287   : > { %v1831_v24 = vmul.f32 %v3456_v3, %v1807_v31  ;;  %v1817_v2 = vpop.permute.xlu1 %1816  ;;  %v1830_v3 = vmul.f32 %v3476_v22, %v1802_v33 }
 0x288   : > { %v1766_v4 = vmax.f32 %v1764_v53, %v1765_v63  ;;  %v1780_v5 = vmin.f32 %v1778_v54, %v1779_v1  ;;  %v1833_v61 = vmul.f32 %v3472_v21, %v1817_v2  ;;  %v1615_v63 = vadd.f32 %v1614_v49, %v1537_v56 }
 0x289   : > { %v1839_v16 = vmax.f32 %v1831_v24, %v1838_v9  ;;  %v1853_v13 = vmin.f32 %v1831_v24, %v1852_v55 }
 0x28a   : > { %v1822_v10 = vpop.permute.xlu0 %1821  ;;  %v1767_v23 = vrot.slane %v1766_v4, 2  ;;  %v1781_v20 = vrot.slane %v1780_v5, 2  ;;  %v1836_v14 = vmax.f32 %v1829_v15, %v1833_v61  ;;  %v1850_v17 = vmin.f32 %v1829_v15, %v1833_v61 }
 0x28b   : > { %v1834_v18 = vmul.f32 %v3427_v41, %v1822_v10  ;;  %v1812_v11 = vpop.permute.xlu1 %1811  ;;  %v1627_v41 = vrot.slane %v1626_v7, 1 }
 0x28c   : > { %v1832_v21 = vmul.f32 %v3438_v51, %v1812_v11  ;;  %v1768_v37 = vmax.f32 %v1766_v4, %v1767_v23  ;;  %v1782_v42 = vmin.f32 %v1780_v5, %v1781_v20  ;;  %v1550_v51 = vmin.f32 %v1548_v6, %v1549_v26 }
 0x28d   : > { %v1837_v25 = vmax.f32 %v1830_v3, %v1834_v18  ;;  %v1851_v29 = vmin.f32 %v1830_v3, %v1834_v18  ;;  %v1628_v27 = vmin.f32 %v1626_v7, %v1627_v41  ;;  %v1693_v4 = vadd.f32 %v1692_v44, %v1615_v63 }
 0x28e   : > { %v1841_v22 = vmax.f32 %v1839_v16, %v1832_v21  ;;  %v1855_v28 = vmin.f32 %v1853_v13, %v1832_v21  ;;  %v1769_v33 = vrot.slane %v1768_v37, 1  ;;  %v1783_v50 = vrot.slane %v1782_v42, 1 }
 0x28f   : > { %v1840_v12 = vmax.f32 %v1836_v14, %v1837_v25  ;;  %v1854_v34 = vmin.f32 %v1850_v17, %v1851_v29  ;;  %v1551_v57 = vadd.f32 %v1550_v51, %v3510_v40 }
 0x290   : > { %v1770_v31 = vmax.f32 %v1768_v37, %v1769_v33  ;;  %v1784_v24 = vmin.f32 %v1782_v42, %v1783_v50 }
 0x291   : > { %v1842_v43 = vmax.f32 %v1840_v12, %v1841_v22  ;;  %v1856_v32 = vmin.f32 %v1854_v34, %v1855_v28  ;;  %v1629_v1 = vadd.f32 %v1628_v27, %v1551_v57 }
 0x292   : > { %v1771_v7 = vadd.f32 %v1770_v31, %v1693_v4 }
 0x293   : > { %v1843_v48 = vrot.slane %v1842_v43, 4  ;;  %v1857_v35 = vrot.slane %v1856_v32, 4  ;;  %v1707_v5 = vadd.f32 %v1706_v58, %v1629_v1 }
 0x295   : > { %v1844_v53 = vmax.f32 %v1842_v43, %v1843_v48  ;;  %v1858_v54 = vmin.f32 %v1856_v32, %v1857_v35  ;;  %v1785_v61 = vadd.f32 %v1784_v24, %v1707_v5 }
 0x297   : > { %v1845_v59 = vrot.slane %v1844_v53, 2  ;;  %v1859_v62 = vrot.slane %v1858_v54, 2 }
 0x299   : > { %v1846_v2 = vmax.f32 %v1844_v53, %v1845_v59  ;;  %v1860_v0 = vmin.f32 %v1858_v54, %v1859_v62 }
 0x29b   : > { %v1847_v6 = vrot.slane %v1846_v2, 1  ;;  %v1861_v60 = vrot.slane %v1860_v0, 1 }
 0x29d   : > { %v1848_v8 = vmax.f32 %v1846_v2, %v1847_v6  ;;  %v1862_v39 = vmin.f32 %v1860_v0, %v1861_v60 }
 0x29f   : > { %v1849_v52 = vadd.f32 %v1848_v8, %v1771_v7  ;;  %v1863_v40 = vadd.f32 %v1862_v39, %v1785_v61 }
 0x2a1   : > { %1865 = vst [vmem:[#allocation3 + $0x1] sm:$0x1] %v1849_v52  ;;  %1866 = vst [vmem:[#allocation3 + $0x2] sm:$0x1] %v1863_v40 }
 0x2a8   : > { %v1867_v9 = vld [vmem:[#allocation3] sm:$0x7] }
 0x2a9   : > { %2463 = vmatmul.mubr.f32.vlgmr.msra.gmra.mxu1 %v1867_v9 }
 0x369   : > { %v1950_v55 = vpop.f32.mrf.mxu1 }
 0x36a   : > { %v1954_v10 = vmax.f32 %v1950_v55, 0.0 }
 0x36b   : > { %v2464_v15 = vpop.f32.mrf.mxu1 }
 0x36c   : > { %2468 = vmatmul.mubr.msk.f32.vlgmr.msra.gmra.mxu0 %vm1956_vm4, %v1954_v10 }
 0x42c   : > { %v2026_v3 = vpop.f32.mrf.mxu0 }
 0x42d   : > { %v2031_v16 = vsel %vm2030_vm5, %v2026_v3, 0.0 }
 0x42e   : > { %v2032_v18 = vrot.slane %v2031_v16, 4  ;;  %v2469_v11 = vpop.f32.mrf.mxu0 }
 0x430   : > { %v2033_v23 = vadd.f32 %v2032_v18, %v2031_v16 }
 0x432   : > { %v2034_v20 = vrot.slane %v2033_v23, 2 }
 0x434   : > { %v2035_v13 = vadd.f32 %v2034_v20, %v2033_v23 }
 0x436   : > { %v2036_v21 = vrot.slane %v2035_v13, 1 }
 0x438   : > { %v2037_v14 = vadd.f32 %v2036_v21, %v2035_v13 }
 0x43a   : > { %v2267_v17 = vmul.f32 -1.442695, %v2037_v14 }
 0x43c   : > { %2599 = vpow2.f32 %v2267_v17 }
 0x449   : > { %v2600_v25 = vpop.eup %2599 }
 0x44a   : > { %v2041_v29 = vadd.f32 1.0, %v2600_v25 }
 0x44c   : > { %2601 = vrcp.f32 %v2041_v29 }
 0x459   : > { %v2602_v19 = vpop.eup %2601 }
 0x45a   : > { %2044 = vst [vmem:[%s2876_s28] sm:$0x1] %v2602_v19 }
 0x45b PF: > { %s2268_s1 = sshll.u32 %s2706_s27, 4  ;;  %s2058_s10 = sshll.u32 %s2876_s28, 4  ;;  %s2059_s10 = int_to_ptr.vmem [resolvable:$true] %s2058_s10 }
 0x45c   : > { %s2056_s9 = scalar_lea.hbm %s3619_s6, %s2268_s1  ;;  %s2046_s13 = scalar_lea.sflag [#allocation6], %s344_s20 }
 0x45d   : > { %s2610_s7 = scalar_lea.vmem %s2059_s10, 16  ;;  %s2726_s26 = smov [#allocation5]  }
 0x45e   : > { %p2611_p7 = scmp.ne.s32.totalorder %s2059_s10, %s2610_s7  ;;  %s2614_s11 = sshll.u32 %s2726_s26, 4  ;;  %s2615_s11 = int_to_ptr.vmem [resolvable:$false] %s2614_s11 }
 0x45f   : > { %s2616_s12 = scalar_lea.vmem %s2615_s11, 32  ;;  %p2617_p11 = scmp.lt.s32.totalorder %s2059_s10, %s2615_s11 }
 0x460   : > { %p2612_p8 = pnand %p2611_p7, %p2841_p10  ;;  %p2618_p13 = scmp.lt.s32.totalorder %s2616_s12, %s2610_s7 }
 0x462   : > { %p2613_p9 = pneg %p2612_p8  ;;  %p2619_p0 = por %p2618_p13, %p2617_p11 }
 0x464   : > { %p2620_p1 = pnand %p2619_p0, %p2613_p9 }
 0x466   : > { %2623 = shalt.err (!%p2620_p1)
}
 0x467   : > { %s2624_s27 = scalar_lea.hbm %s2056_s9, 16  ;;  %s2628_s16 = scalar_lea.hbm %s3619_s6, 32 }
 0x468   : > { %p2625_p2 = scmp.ne.s32.totalorder %s2056_s9, %s2624_s27  ;;  %p2629_p5 = scmp.lt.s32.totalorder %s2056_s9, %s3619_s6 }
 0x469   : > { %p2630_p6 = scmp.lt.s32.totalorder %s2628_s16, %s2624_s27 }
 0x46a   : > { %p2626_p3 = pnand %p2625_p2, %p2841_p10 }
 0x46b   : > { %p2631_p7 = por %p2630_p6, %p2629_p5 }
 0x46c   : > { %p2627_p4 = pneg %p2626_p3 }
 0x46e   : > { %p2632_p8 = pnand %p2631_p7, %p2627_p4 }
 0x470   : > { %2635 = shalt.err (!%p2632_p8)
}
 0x471   : > { %2504 = dma.vmem_to_hbm [thread:$0]  (%p2841_p10), %s2059_s10, 16, %s2056_s9, %s2046_s13  }
 0x472 PF: > { %p2510_p9 = scmp.ge.s32.totalorder %s2718_s30, 2  ;;  %s2070_s1 = sand.u32 1, %s2682_s21  }
 0x473   : > { %s2071_s24 = scalar_lea.sflag [#allocation6], %s2070_s1 }
 0x474   : > { %p2507_p11 = pnand %p2510_p9, %p2848_p12 }
 0x476   : > { %p2508_p13 = pneg %p2507_p11 }
 0x478   : > { %2677 = dma.done.wait (%p2508_p13), %s2071_s24, 16  }
 0x479   : > { %2679 = vsyncadd (%p2508_p13), %s2071_s24, 4294967280  ;;  %s19_s30 = sadd.s32 1, %s2718_s30   ;;  %s3633_s26 = sld [smem:[#allocation8_spill]] }
 0x47a   : > { %p16_p0 = scmp.ge.s32.totalorder %s19_s30, 6   ;;  %s3634_s27 = sld [smem:[#allocation9_spill]] }
 0x47b   : > { %s3635_s28 = sld [smem:[#allocation10_spill]]  ;;  %s3637_s21 = smov %s2686_s22 }
 0x47c   : > { %s3636_s29 = sld [smem:[#allocation11_spill]]  ;;  %s3638_s22 = smov %s2690_s23 }
 0x47d   : > { %s3639_s23 = smov %s2846_s18  ;;  %s3640_s24 = smov %s2698_s25 }
 0x47e   : > { %s3641_s25 = smov %s2835_s15  ;;  %18 = sbr.rel (!%p16_p0) target bundleno = 8 (0x8), region = 148 }
 0x483   :  { %2075 = vsyncpa [#allocation6], 1 }
 0x484   :  { %2077 = vsyncpa [#allocation6 + $0x1], 1 }

</bundles_post_ra>
